<compile_context>
chip_gen: v5e
topology: v5e:2x2
jax: 0.10.0
libtpu: 0.0.40
codegen_flags: <defaults>
</compile_context>

<pallas_src>
import jax
import jax.numpy as jnp
from jax.experimental import pallas as pl
from jax.experimental.pallas import tpu as pltpu


def _round_up(n, m):
    return ((n + m - 1) // m) * m


def _vmem_cap_bytes():
    """Generation-aware VMEM cap: 7/8 of per-core VMEM (56 MiB v7x, 112 MiB v5e/v6e)."""
    try:
        cap = int(pltpu.get_tpu_info().vmem_capacity_bytes)
    except Exception:
        cap = 64 << 20  # conservative fallback (v7x-sized)
    return (cap * 7) // 8


def _pick_tile_b(B, target, min_steps=4):
    """Largest tile <= target (multiple of 8) with >= min_steps grid steps when
    the batch allows, and <= ~10% padded-batch waste."""
    tile = _round_up(min(target, max(B, 8)), 8)
    # guarantee enough grid steps for megacore sharding + pipelining
    while tile > 8 and pl.cdiv(B, tile) < min_steps:
        tile = max(8, _round_up(tile // 2, 8))
    # bound padding waste
    while tile > 8:
        Bp = _round_up(B, tile)
        if (Bp - B) <= 0.10 * Bp:
            break
        tile = max(8, _round_up(tile // 2, 8))
    return tile


def gts_kernel(x_ref, w1_ref, b1_ref, w2_ref, b2_ref, w3_ref, b3_ref, o_ref):
    """One batch tile: 3x (matmul + bias [+ ReLU]) then row-wise L2 normalize.

    x_ref   : (tile_b, Ep) float32 — pipelined batch tile (cast to bf16 here)
    w*_ref  : full weight matrices (compute dtype), VMEM-resident single copy
    b*_ref  : (1, H) float32 biases, VMEM-resident
    o_ref   : (tile_b, Ep) output tile
    """
    cdt = w1_ref.dtype  # compute dtype for MXU inputs (bf16 by default)

    x = x_ref[...].astype(cdt)  # in-kernel cast: cheap VPU work under MXU-bound loop
    h1 = jnp.dot(x, w1_ref[...], preferred_element_type=jnp.float32)
    h1 = jnp.maximum(h1 + b1_ref[...], 0.0)

    h2 = jnp.dot(h1.astype(cdt), w2_ref[...], preferred_element_type=jnp.float32)
    h2 = jnp.maximum(h2 + b2_ref[...], 0.0)

    y = jnp.dot(h2.astype(cdt), w3_ref[...], preferred_element_type=jnp.float32)
    y = y + b3_ref[...]

    # F.normalize(y, dim=1) == y / max(||y||, 1e-12) == y * rsqrt(max(ss, 1e-24))
    ss = jnp.sum(y * y, axis=1, keepdims=True)
    inv_norm = jax.lax.rsqrt(jnp.maximum(ss, 1e-24))
    o_ref[...] = (y * inv_norm).astype(o_ref.dtype)


def gts_forward(x, params, *, tile_b=512, compute_dtype=jnp.bfloat16,
                out_dtype=jnp.float32):
    """Forward pass of Gts_model.

    x: (B, E) float32.
    params: w1 (E,H1), b1 (1,H1), w2 (H1,H2), b2 (1,H2), w3 (H2,E), b3 (1,E),
            weights stored as (in_features, out_features).
    out_dtype: jnp.bfloat16 halves output HBM traffic (useful on v5e); default
               float32 matches the reference exactly.
    """
    B, E = x.shape
    w1, b1 = params["w1"], params["b1"]
    w2, b2 = params["w2"], params["b2"]
    w3, b3 = params["w3"], params["b3"]
    H1, H2 = w1.shape[1], w2.shape[1]

    # --- pad feature dims to lane multiples (128); exact because padding is zero.
    Ep, H1p, H2p = (_round_up(E, 128), _round_up(H1, 128), _round_up(H2, 128))
    w1p = jnp.pad(w1, ((0, Ep - E), (0, H1p - H1))).astype(compute_dtype)
    w2p = jnp.pad(w2, ((0, H1p - H1), (0, H2p - H2))).astype(compute_dtype)
    w3p = jnp.pad(w3, ((0, H2p - H2), (0, Ep - E))).astype(compute_dtype)
    b1p = jnp.pad(b1, ((0, 0), (0, H1p - H1))).astype(jnp.float32)
    b2p = jnp.pad(b2, ((0, 0), (0, H2p - H2))).astype(jnp.float32)
    b3p = jnp.pad(b3, ((0, 0), (0, Ep - E))).astype(jnp.float32)

    # --- batch tiling: enough grid steps for 2-TC megacore + pipelining,
    #     bounded padding waste, big enough tiles to saturate the MXU M dim.
    tile_b = _pick_tile_b(B, tile_b)
    Bp = _round_up(B, tile_b)
    grid = (Bp // tile_b,)

    # x stays float32; pad only if actually needed (no extra full-batch cast pass).
    if Bp != B or Ep != E:
        xp = jnp.pad(x, ((0, Bp - B), (0, Ep - E)))
    else:
        xp = x
    xp = xp.astype(jnp.float32)

    # --- VMEM budget: single-buffered weights/biases + double-buffered x/out
    #     tiles + f32 intermediates + bf16 MXU-input copies + scratch headroom.
    isz = jnp.dtype(compute_dtype).itemsize
    osz = jnp.dtype(out_dtype).itemsize
    w_bytes = (Ep * H1p + H1p * H2p + H2p * Ep) * isz + (H1p + H2p + Ep) * 4
    act_bytes = tile_b * (
        2 * Ep * 4                 # double-buffered f32 x tile
        + 2 * Ep * osz             # double-buffered output tile
        + (H1p + H2p + Ep) * 4     # f32 intermediates h1, h2, y
        + (Ep + H1p + H2p) * isz   # bf16 re-cast copies of x, h1, h2
    )
    need = w_bytes + act_bytes + (8 << 20)  # Mosaic internal matmul scratch headroom
    vmem_limit = int(min(max(need, 32 << 20), _vmem_cap_bytes()))

    # --- cost estimate so XLA schedules neighbouring ops around the call.
    flops = 2 * Bp * (Ep * H1p + H1p * H2p + H2p * Ep)
    bytes_accessed = Bp * Ep * 4 + Bp * Ep * osz + w_bytes
    cost = pl.CostEstimate(flops=flops, transcendentals=Bp,
                           bytes_accessed=bytes_accessed)

    resident = pl.BlockSpec(memory_space=pltpu.MemorySpace.VMEM)

    out = pl.pallas_call(
        gts_kernel,
        out_shape=jax.ShapeDtypeStruct((Bp, Ep), out_dtype),
        grid=grid,
        in_specs=[
            pl.BlockSpec((tile_b, Ep), lambda i: (i, 0)),  # x: pipelined batch tile
            resident, resident,                            # w1, b1 (single VMEM copy)
            resident, resident,                            # w2, b2
            resident, resident,                            # w3, b3
        ],
        out_specs=pl.BlockSpec((tile_b, Ep), lambda i: (i, 0)),
        compiler_params=pltpu.CompilerParams(
            dimension_semantics=("parallel",),
            vmem_limit_bytes=vmem_limit,
        ),
        cost_estimate=cost,
    )(xp, w1p, b1p, w2p, b2p, w3p, b3p)

    return out[:B, :E]


def init_params(key, embedding_dim, hidden_dim1, hidden_dim2):
    """Deterministic synthetic init (PyTorch-Linear-like uniform fan-in)."""
    ks = jax.random.split(key, 6)

    def lin(kw, kb, fan_in, fan_out):
        bound = 1.0 / jnp.sqrt(fan_in)
        w = jax.random.uniform(kw, (fan_in, fan_out), jnp.float32, -bound, bound)
        b = jax.random.uniform(kb, (1, fan_out), jnp.float32, -bound, bound)
        return w, b

    w1, b1 = lin(ks[0], ks[1], embedding_dim, hidden_dim1)
    w2, b2 = lin(ks[2], ks[3], hidden_dim1, hidden_dim2)
    w3, b3 = lin(ks[4], ks[5], hidden_dim2, embedding_dim)
    return {"w1": w1, "b1": b1, "w2": w2, "b2": b2, "w3": w3, "b3": b3}


def gts_reference(x, p):
    """Pure-JAX f32 reference (matches the PyTorch module)."""
    h1 = jnp.maximum(x @ p["w1"] + p["b1"], 0.0)
    h2 = jnp.maximum(h1 @ p["w2"] + p["b2"], 0.0)
    y = h2 @ p["w3"] + p["b3"]
    n = jnp.sqrt(jnp.sum(y * y, axis=1, keepdims=True))
    return y / jnp.maximum(n, 1e-12)


if __name__ == "__main__":
    # Small, TPU-tile-friendly stand-in for the original 800 -> 1200 -> 1600 -> 800 MLP.
    batch = 512
    embedding_dim = 128
    hidden_dim1 = 256
    hidden_dim2 = 512

    key = jax.random.PRNGKey(0)
    k_params, k_x = jax.random.split(key)
    params = init_params(k_params, embedding_dim, hidden_dim1, hidden_dim2)
    x = jax.random.normal(k_x, (batch, embedding_dim), jnp.float32)

    out = jax.block_until_ready(gts_forward(x, params))
    ref = jax.block_until_ready(gts_reference(x, params))

    assert out.shape == (batch, embedding_dim)
    err = float(jnp.max(jnp.abs(out - ref)))
    # bf16 MXU inputs with f32 accumulation on a unit-norm output: ~1e-3 level error.
    assert err < 3e-2, f"max abs err {err}"
    print("KERNEL_OK")
</pallas_src>

<mosaic_0001>
module attributes {stable_mosaic.version = 11 : i64} {
  func.func @gts_kernel(%arg0: i32, %arg1: memref<128x128xf32, #tpu.memory_space<vmem>>, %arg2: memref<128x256xbf16, #tpu.memory_space<vmem>>, %arg3: memref<1x256xf32, #tpu.memory_space<vmem>>, %arg4: memref<256x512xbf16, #tpu.memory_space<vmem>>, %arg5: memref<1x512xf32, #tpu.memory_space<vmem>>, %arg6: memref<512x128xbf16, #tpu.memory_space<vmem>>, %arg7: memref<1x128xf32, #tpu.memory_space<vmem>>, %arg8: memref<128x128xf32, #tpu.memory_space<vmem>>) attributes {dimension_semantics = [#tpu.dimension_semantics<parallel>], iteration_bounds = array<i64: 4>, scalar_prefetch = 0 : i64, scratch_operands = 0 : i64, tpu.core_type = #tpu.core_type<tc>, window_params = [{transform_indices = @transform_0, window_bounds = array<i64: 128, 128>}, {pipeline_mode = #tpu.pipeline_mode<synchronous>, transform_indices = @transform_1, window_bounds = array<i64: 128, 256>}, {pipeline_mode = #tpu.pipeline_mode<synchronous>, transform_indices = @transform_2, window_bounds = array<i64: 1, 256>}, {pipeline_mode = #tpu.pipeline_mode<synchronous>, transform_indices = @transform_3, window_bounds = array<i64: 256, 512>}, {pipeline_mode = #tpu.pipeline_mode<synchronous>, transform_indices = @transform_4, window_bounds = array<i64: 1, 512>}, {pipeline_mode = #tpu.pipeline_mode<synchronous>, transform_indices = @transform_5, window_bounds = array<i64: 512, 128>}, {pipeline_mode = #tpu.pipeline_mode<synchronous>, transform_indices = @transform_6, window_bounds = array<i64: 1, 128>}, {transform_indices = @transform_7, window_bounds = array<i64: 128, 128>}]} {
    %c0 = arith.constant 0 : index
    %c0_0 = arith.constant 0 : index
    %0 = vector.load %arg1[%c0, %c0_0] : memref<128x128xf32, #tpu.memory_space<vmem>>, vector<128x128xf32>
    %1 = arith.truncf %0 : vector<128x128xf32> to vector<128x128xbf16>
    %c0_1 = arith.constant 0 : index
    %c0_2 = arith.constant 0 : index
    %2 = vector.load %arg2[%c0_1, %c0_2] : memref<128x256xbf16, #tpu.memory_space<vmem>>, vector<128x256xbf16>
    %cst = arith.constant dense<0.000000e+00> : vector<128x256xf32>
    %3 = tpu.matmul %1, %2, %cst {dimension_numbers = #tpu.dot_dimension_numbers<[1], [0], [0], [1], [0, 0, 1, 1], [], []>} : vector<128x128xbf16>, vector<128x256xbf16>, vector<128x256xf32> -> vector<128x256xf32>
    %c0_3 = arith.constant 0 : index
    %c0_4 = arith.constant 0 : index
    %4 = vector.load %arg3[%c0_3, %c0_4] : memref<1x256xf32, #tpu.memory_space<vmem>>, vector<1x256xf32>
    %5 = vector.broadcast %4 : vector<1x256xf32> to vector<128x256xf32>
    %6 = arith.addf %3, %5 : vector<128x256xf32>
    %cst_5 = arith.constant 0.000000e+00 : f32
    %7 = vector.broadcast %cst_5 : f32 to vector<128x256xf32>
    %8 = arith.maximumf %6, %7 : vector<128x256xf32>
    %9 = arith.truncf %8 : vector<128x256xf32> to vector<128x256xbf16>
    %c0_6 = arith.constant 0 : index
    %c0_7 = arith.constant 0 : index
    %10 = vector.load %arg4[%c0_6, %c0_7] : memref<256x512xbf16, #tpu.memory_space<vmem>>, vector<256x512xbf16>
    %cst_8 = arith.constant dense<0.000000e+00> : vector<128x512xf32>
    %11 = tpu.matmul %9, %10, %cst_8 {dimension_numbers = #tpu.dot_dimension_numbers<[1], [0], [0], [1], [0, 0, 1, 1], [], []>} : vector<128x256xbf16>, vector<256x512xbf16>, vector<128x512xf32> -> vector<128x512xf32>
    %c0_9 = arith.constant 0 : index
    %c0_10 = arith.constant 0 : index
    %12 = vector.load %arg5[%c0_9, %c0_10] : memref<1x512xf32, #tpu.memory_space<vmem>>, vector<1x512xf32>
    %13 = vector.broadcast %12 : vector<1x512xf32> to vector<128x512xf32>
    %14 = arith.addf %11, %13 : vector<128x512xf32>
    %cst_11 = arith.constant 0.000000e+00 : f32
    %15 = vector.broadcast %cst_11 : f32 to vector<128x512xf32>
    %16 = arith.maximumf %14, %15 : vector<128x512xf32>
    %17 = arith.truncf %16 : vector<128x512xf32> to vector<128x512xbf16>
    %c0_12 = arith.constant 0 : index
    %c0_13 = arith.constant 0 : index
    %18 = vector.load %arg6[%c0_12, %c0_13] : memref<512x128xbf16, #tpu.memory_space<vmem>>, vector<512x128xbf16>
    %cst_14 = arith.constant dense<0.000000e+00> : vector<128x128xf32>
    %19 = tpu.matmul %17, %18, %cst_14 {dimension_numbers = #tpu.dot_dimension_numbers<[1], [0], [0], [1], [0, 0, 1, 1], [], []>} : vector<128x512xbf16>, vector<512x128xbf16>, vector<128x128xf32> -> vector<128x128xf32>
    %c0_15 = arith.constant 0 : index
    %c0_16 = arith.constant 0 : index
    %20 = vector.load %arg7[%c0_15, %c0_16] : memref<1x128xf32, #tpu.memory_space<vmem>>, vector<1x128xf32>
    %21 = vector.broadcast %20 : vector<1x128xf32> to vector<128x128xf32>
    %22 = arith.addf %19, %21 : vector<128x128xf32>
    %23 = arith.mulf %22, %22 : vector<128x128xf32>
    %cst_17 = arith.constant dense<0.000000e+00> : vector<128xf32>
    %24 = vector.multi_reduction <add>, %23, %cst_17 [1] : vector<128x128xf32> to vector<128xf32>
    %25 = vector.shape_cast %24 : vector<128xf32> to vector<128x1xf32>
    %cst_18 = arith.constant 1.000000e-24 : f32
    %26 = vector.broadcast %cst_18 : f32 to vector<128x1xf32>
    %27 = arith.maximumf %25, %26 : vector<128x1xf32>
    %28 = math.rsqrt %27 : vector<128x1xf32>
    %29 = vector.broadcast %28 : vector<128x1xf32> to vector<128x128xf32>
    %30 = arith.mulf %22, %29 : vector<128x128xf32>
    %c0_19 = arith.constant 0 : index
    %c0_20 = arith.constant 0 : index
    %31 = vector.load %arg8[%c0_19, %c0_20] : memref<128x128xf32, #tpu.memory_space<vmem>>, vector<128x128xf32>
    tpu.vector_store %arg8[%c0_19, %c0_20], %30 {strides = array<i32>} : memref<128x128xf32, #tpu.memory_space<vmem>>, vector<128x128xf32>,
    return
  }
  func.func @transform_0(%arg0: i32) -> (i32, i32) {
    %c0_i32 = arith.constant 0 : i32
    %c0_i32_0 = arith.constant 0 : i32
    return %arg0, %c0_i32 : i32, i32
  }
  func.func @transform_1(%arg0: i32) -> (i32, i32) {
    %c0_i32 = arith.constant 0 : i32
    %c0_i32_0 = arith.constant 0 : i32
    %c0_i32_1 = arith.constant 0 : i32
    return %c0_i32, %c0_i32_0 : i32, i32
  }
  func.func @transform_2(%arg0: i32) -> (i32, i32) {
    %c0_i32 = arith.constant 0 : i32
    %c0_i32_0 = arith.constant 0 : i32
    %c0_i32_1 = arith.constant 0 : i32
    return %c0_i32, %c0_i32_0 : i32, i32
  }
  func.func @transform_3(%arg0: i32) -> (i32, i32) {
    %c0_i32 = arith.constant 0 : i32
    %c0_i32_0 = arith.constant 0 : i32
    %c0_i32_1 = arith.constant 0 : i32
    return %c0_i32, %c0_i32_0 : i32, i32
  }
  func.func @transform_4(%arg0: i32) -> (i32, i32) {
    %c0_i32 = arith.constant 0 : i32
    %c0_i32_0 = arith.constant 0 : i32
    %c0_i32_1 = arith.constant 0 : i32
    return %c0_i32, %c0_i32_0 : i32, i32
  }
  func.func @transform_5(%arg0: i32) -> (i32, i32) {
    %c0_i32 = arith.constant 0 : i32
    %c0_i32_0 = arith.constant 0 : i32
    %c0_i32_1 = arith.constant 0 : i32
    return %c0_i32, %c0_i32_0 : i32, i32
  }
  func.func @transform_6(%arg0: i32) -> (i32, i32) {
    %c0_i32 = arith.constant 0 : i32
    %c0_i32_0 = arith.constant 0 : i32
    %c0_i32_1 = arith.constant 0 : i32
    return %c0_i32, %c0_i32_0 : i32, i32
  }
  func.func @transform_7(%arg0: i32) -> (i32, i32) {
    %c0_i32 = arith.constant 0 : i32
    %c0_i32_0 = arith.constant 0 : i32
    return %arg0, %c0_i32 : i32, i32
  }
}

</mosaic_0001>

<bundles_post_ra>
// kernel: tpu_custom_call.1
= control target key start
LH: loop header
LB: loop body
LE: loop exit
PB: predicated region body
PF: predicated region fallthrough
CT: control target
= control target key end

     0   :  { %s4034_s0 = inlined_call_operand.hbm [shape: f32[512,128], index: 0, kind: input, shape index: {}]   ;;  %s4035_s1 = inlined_call_operand.hbm [shape: bf16[128,256], index: 1, kind: input, shape index: {}]   ;;  %s4036_s2 = inlined_call_operand.hbm [shape: f32[1,256], index: 2, kind: input, shape index: {}]   ;;  %s4037_s3 = inlined_call_operand.hbm [shape: bf16[256,512], index: 3, kind: input, shape index: {}]   ;;  %s4038_s4 = inlined_call_operand.hbm [shape: f32[1,512], index: 4, kind: input, shape index: {}]   ;;  %s4039_s5 = inlined_call_operand.hbm [shape: bf16[512,128], index: 5, kind: input, shape index: {}]   ;;  %s4040_s6 = inlined_call_operand.vmem [shape: f32[1,128], index: 6, kind: input, shape index: {}]   ;;  %s4041_s7 = inlined_call_operand.hbm [shape: f32[512,128], index: 7, kind: output, shape index: {}]  }
   0x1   :  { %4044 = sst [smem:[#allocation19_spill]] %s4035_s1 }
   0x2   :  { %12 = vsyncpa [#allocation3], 0 }
   0x3   :  { %14 = vsyncpa [#allocation3 + $0x1], 0 }
   0x4   :  { %15 = vsyncpa [#allocation6], 0 }
   0x5   :  { %16 = vsyncpa [#allocation9], 0 }
   0x6   :  { %17 = vsyncpa [#allocation12], 0 }
   0x7   :  { %18 = vsyncpa [#allocation4], 0 }
   0x8   :  { %20 = vsyncpa [#allocation4 + $0x1], 0  ;;  %s3436_s24 = smov 0   ;;  %s3438_s25 = smov 0  }
   0x9   :  { %s3440_s26 = smov 0   ;;  %s3442_s27 = smov 0  }
   0xa LB: > { %s4045_s1 = sld [smem:[#allocation19_spill]]  ;;  %s3460_s8 = sadd.s32 4294967295, %s3381_s27   ;;  %s3381_s27 = sphi %s3442_s27, %s4057_s27   ;;  %s3377_s26 = sphi %s3440_s26, %s4056_s26   ;;  %s3373_s25 = sphi %s3438_s25, %s4055_s25   ;;  %s3369_s24 = sphi %s3436_s24, %s4054_s24  }
   0xb   : > { %p2384_p0 = scmp.ge.s32.totalorder %s3381_s27, 1  ;;  %p47_p1 = scmp.eq.s32.totalorder %s3460_s8, 0 }
   0xc   : > { %p209_p2 = scmp.lt.s32.totalorder %s3381_s27, 5  ;;  %s3383_s10 = smov [#allocation5]  }
   0xd   : > { %s222_s11 = sshll.u32 %s3383_s10, 4  ;;  %s246_s14 = sshll.u32 %s4037_s3, 4  ;;  %s223_s11 = int_to_ptr.vmem [resolvable:$true] %s222_s11  ;;  %s247_s14 = int_to_ptr.hbm [resolvable:$true] %s246_s14 }
   0xe   : > { %p3465_p3 = pnand %p2384_p0, %p209_p2  ;;  %s3384_s16 = smov [#allocation8]  }
   0xf   : > { %s248_s17 = sshll.u32 %s3384_s16, 4  ;;  %s4042_s18 = smov 128   ;;  %s249_s17 = int_to_ptr.vmem [resolvable:$true] %s248_s17 }
  0x10   : > { %s220_s30 = sshll.u32 %s4045_s1, 4  ;;  %p3009_p4 = pneg %p3465_p3  ;;  %s221_s30 = int_to_ptr.hbm [resolvable:$true] %s220_s30 }
  0x11   : > { %s4043_s19 = smov 8   ;;  %s3387_s20 = smov 256  }
  0x12   : > { %p3476_p5 = pnand %p3009_p4, %p47_p1  ;;  %s3388_s21 = smov 16  }
  0x13   : > { %s235_s28 = sshll.u32 %s4036_s2, 4  ;;  %s3389_s29 = smov [#allocation7]   ;;  %s236_s28 = int_to_ptr.hbm [resolvable:$true] %s235_s28 }
  0x14   : > { %3012 = dma.hbm_to_vmem [thread:$0]  (!%p3476_p5), %s221_s30, 2048, %s223_s11, [#allocation6], %s4042_s18, %s4042_s18, %s4043_s19  }
  0x15   : > { %3018 = dma.hbm_to_vmem [thread:$0]  (!%p3476_p5), %s247_s14, 8192, %s249_s17, [#allocation9], %s3387_s20, %s3387_s20, %s3388_s21  }
  0x16   : > { %s237_s10 = sshll.u32 %s3389_s29, 4  ;;  %s261_s30 = sshll.u32 %s4038_s4, 4  ;;  %s238_s10 = int_to_ptr.vmem [resolvable:$true] %s237_s10  ;;  %s262_s30 = int_to_ptr.hbm [resolvable:$true] %s261_s30 }
  0x17   : > { %3015 = dma.hbm_to_vmem [thread:$0]  (!%p3476_p5), %s236_s28, 32, %s238_s10, [#allocation6]  }
  0x18   : > { %s3390_s11 = smov [#allocation10]   ;;  %s272_s20 = sshll.u32 %s4039_s5, 4  ;;  %s273_s20 = int_to_ptr.hbm [resolvable:$true] %s272_s20 }
  0x19   : > { %s263_s14 = sshll.u32 %s3390_s11, 4  ;;  %s3391_s21 = smov [#allocation11]   ;;  %s264_s14 = int_to_ptr.vmem [resolvable:$true] %s263_s14 }
  0x1a   : > { %3021 = dma.hbm_to_vmem [thread:$0]  (!%p3476_p5), %s262_s30, 64, %s264_s14, [#allocation9]  }
  0x1b   : > { %s274_s22 = sshll.u32 %s3391_s21, 4  ;;  %s3392_s23 = smov 64   ;;  %s275_s22 = int_to_ptr.vmem [resolvable:$true] %s274_s22 }
  0x1c   : > { %s3393_s28 = smov 4   ;;  %s2383_s29 = sadd.s32 4294967294, %s3381_s27  }
  0x1d   : > { %3024 = dma.hbm_to_vmem [thread:$0]  (!%p3476_p5), %s273_s20, 4096, %s275_s22, [#allocation12], %s3392_s23, %s3392_s23, %s3393_s28  }
  0x1e   : > { %s3504_s10 = sadd.s32 1, %s3381_s27   ;;  %s33_s12 = sadd.s32 1, %s3377_s26 }
  0x1f   : > { %s30_s13 = ssub.s32 %s3381_s27, %s3504_s10  ;;  %p40_p6 = scmp.ne.s32.totalorder %s3377_s26, %s3373_s25 }
  0x20   : > { %p31_p7 = scmp.eq.s32.totalorder %s30_s13, 0  ;;  %p41_p8 = scmp.eq.s32.totalorder %s3381_s27, 0 }
  0x21   : > { %p46_p9 = scmp.ne.s32.totalorder %s3373_s25, %s3369_s24  ;;  %p196_p10 = scmp.eq.s32.totalorder %s3460_s8, 3 }
  0x22   : > { %s3516_s30 = scalar_select %p31_p7, %s3377_s26, %s33_s12  }
  0x23   : > { %p3520_p11 = por %p47_p1, %p46_p9  ;;  %p3524_p12 = por %p196_p10, %p40_p6 }
  0x24   : > { %p202_p13 = scmp.eq.s32.totalorder %s2383_s29, 3  ;;  %p42_p0 = por %p41_p8, %p40_p6 }
  0x25   : > { %s291_s14 = sand.u32 1, %s3377_s26   ;;  %p3038_p4 = scmp.lt.s32.totalorder %s3381_s27, 4 }
  0x26   : > { %p3529_p2 = por %p202_p13, %p46_p9  ;;  %s2391_s17 = sshll.u32 %s291_s14, 7 }
  0x27   : > { %s2855_s20 = sshll.u32 %s3381_s27, 7  ;;  %s295_s12 = scalar_lea.vmem [#allocation2], %s2391_s17 }
  0x28   : > { %s300_s23 = scalar_lea.hbm %s4034_s0, %s2855_s20  ;;  %s303_s13 = sshll.u32 %s295_s12, 4  ;;  %s304_s13 = int_to_ptr.vmem [resolvable:$true] %s303_s13 }
  0x29   : > { %s301_s28 = sshll.u32 %s300_s23, 4  ;;  %p3538_p5 = pnand %p3038_p4, %p42_p0  ;;  %s302_s28 = int_to_ptr.hbm [resolvable:$true] %s301_s28 }
  0x2a   : > { %s292_s18 = scalar_lea.sflag [#allocation3], %s291_s14  ;;  %s3273_s19 = sshra.s32 %s302_s28, 4  ;;  %s3274_s19 = int_to_ptr.hbm [resolvable:$true] %s3273_s19 }
  0x2b   : > { %s3275_s1 = scalar_lea.hbm %s3274_s19, 128  ;;  %p3277_p7 = pneg %p3538_p5 }
  0x2c   : > { %p3276_p6 = scmp.ne.s32.totalorder %s3274_s19, %s3275_s1  ;;  %s3280_s17 = scalar_lea.hbm %s4034_s0, 512 }
  0x2d   : > { %p3281_p10 = scmp.lt.s32.totalorder %s3274_s19, %s4034_s0  ;;  %p3282_p13 = scmp.lt.s32.totalorder %s3280_s17, %s3275_s1 }
  0x2e   : > { %p3278_p8 = pnand %p3277_p7, %p3276_p6 }
  0x2f   : > { %p3283_p0 = por %p3282_p13, %p3281_p10 }
  0x30   : > { %p3279_p9 = pneg %p3278_p8 }
  0x32   : > { %p3284_p4 = pnand %p3283_p0, %p3279_p9 }
  0x34   : > { %3287 = shalt.err (!%p3284_p4)
}
  0x35   : > { %s4052_s14 = smov 8   ;;  %s4053_s12 = smov 128  }
  0x36   : > { %3028 = dma.hbm_to_vmem [thread:$0]  (!%p3538_p5), %s302_s28, 2048, %s304_s13, %s292_s18, %s4053_s12, %s4053_s12, %s4052_s14  }
  0x37   : > { %315 = sbr.rel (%p3465_p3) target bundleno = 911 (0x38f), region = 48  ;;  %s3558_s20 = sand.u32 (!%p3465_p3), 1, %s3373_s25  }
  0x38   : > { %s2395_s1 = sshll.u32 (!%p3465_p3), %s3558_s20, 7  ;;  %s318_s19 = scalar_lea.sflag (!%p3465_p3), [#allocation3], %s3558_s20 }
  0x39   : > { %s3564_s21 = scalar_lea.vmem (!%p3465_p3), [#allocation2], %s2395_s1 }
  0x3c   : > { %3348 = dma.done.wait (%p3520_p11), %s318_s19, 2048  }
  0x3d   : > { %3350 = vsyncadd (%p3520_p11), %s318_s19, 4294965248 }
  0x3e   : > { %3352 = dma.done.wait (%p47_p1), [#allocation6], 2080  }
  0x3f   : > { %3354 = vsyncadd (%p47_p1), [#allocation6], 4294965216 }
  0x40   : > { %3356 = dma.done.wait (%p47_p1), [#allocation9], 8256  }
  0x41   : > { %3358 = vsyncadd (%p47_p1), [#allocation9], 4294959040 }
  0x42   : > { %3360 = dma.done.wait (%p47_p1), [#allocation12], 4096  }
  0x43   : > { %3362 = vsyncadd (%p47_p1), [#allocation12], 4294963200  ;;  %v2460_v0 = vld [vmem:[#allocation5 + $0x70] sm:$0xf]  ;;  %v2871_v1 = vld [vmem:[#allocation5 + $0x74] sm:$0xf0] }
  0x44   : > { %v2870_v2 = vld [vmem:[#allocation5 + $0x74] sm:$0xf]  ;;  %v2461_v3 = vor.u32 %v2871_v1, %v2460_v0  ;;  %v2462_v4 = vld [vmem:[#allocation5 + $0x78] sm:$0xf0]  ;;  %v2452_v5 = vld [vmem:[#allocation5 + $0x60] sm:$0xf] }
  0x45   : > { %v2869_v6 = vld [vmem:[#allocation5 + $0x64] sm:$0xf0]  ;;  %v2465_v7 = vor.u32 %v2870_v2, %v2462_v4  ;;  %v2868_v8 = vld [vmem:[#allocation5 + $0x64] sm:$0xf]  ;;  %v2454_v9 = vld [vmem:[#allocation5 + $0x68] sm:$0xf0] }
  0x46   : > { %506 = vmatpush.bf16.msra.mxu0 %v2461_v3  ;;  %v2453_v10 = vor.u32 %v2869_v6, %v2452_v5  ;;  %2969 = vmatpush.bf16.msra.mxu2 %v2461_v3  ;;  %v2457_v11 = vor.u32 %v2868_v8, %v2454_v9  ;;  %v2444_v12 = vld [vmem:[#allocation5 + $0x50] sm:$0xf]  ;;  %v2867_v13 = vld [vmem:[#allocation5 + $0x54] sm:$0xf0]  ;;  %v2866_v14 = vld [vmem:[#allocation5 + $0x54] sm:$0xf] }
  0x47   : > { %555 = vmatpush.bf16.msra.mxu1 %v2465_v7  ;;  %2977 = vmatpush.bf16.msra.mxu3 %v2465_v7  ;;  %v2446_v15 = vld [vmem:[#allocation5 + $0x58] sm:$0xf0]  ;;  %v2445_v16 = vor.u32 %v2867_v13, %v2444_v12  ;;  %v2436_v18 = vld [vmem:[#allocation5 + $0x40] sm:$0xf]  ;;  %v2865_v19 = vld [vmem:[#allocation5 + $0x44] sm:$0xf0] }
  0x48   : > { %v2449_v17 = vor.u32 %v2866_v14, %v2446_v15  ;;  %v2864_v20 = vld [vmem:[#allocation5 + $0x44] sm:$0xf]  ;;  %v2438_v21 = vld [vmem:[#allocation5 + $0x48] sm:$0xf0]  ;;  %v2437_v22 = vor.u32 %v2865_v19, %v2436_v18  ;;  %v2428_v24 = vld [vmem:[#allocation5 + $0x30] sm:$0xf] }
  0x49   : > { %v2441_v23 = vor.u32 %v2864_v20, %v2438_v21  ;;  %v2863_v25 = vld [vmem:[#allocation5 + $0x34] sm:$0xf0]  ;;  %v2862_v26 = vld [vmem:[#allocation5 + $0x34] sm:$0xf]  ;;  %v2430_v27 = vld [vmem:[#allocation5 + $0x38] sm:$0xf0] }
  0x4a   : > { %507 = vmatpush.bf16.msra.mxu0 %v2453_v10  ;;  %2970 = vmatpush.bf16.msra.mxu2 %v2453_v10  ;;  %v2429_v28 = vor.u32 %v2863_v25, %v2428_v24  ;;  %v2433_v29 = vor.u32 %v2862_v26, %v2430_v27  ;;  %v2420_v30 = vld [vmem:[#allocation5 + $0x20] sm:$0xf]  ;;  %v2861_v31 = vld [vmem:[#allocation5 + $0x24] sm:$0xf0]  ;;  %v2860_v32 = vld [vmem:[#allocation5 + $0x24] sm:$0xf] }
  0x4b   : > { %556 = vmatpush.bf16.msra.mxu1 %v2457_v11  ;;  %2978 = vmatpush.bf16.msra.mxu3 %v2457_v11  ;;  %v2422_v33 = vld [vmem:[#allocation5 + $0x28] sm:$0xf0]  ;;  %v2421_v34 = vor.u32 %v2861_v31, %v2420_v30  ;;  %v2412_v36 = vld [vmem:[#allocation5 + $0x10] sm:$0xf]  ;;  %v2859_v37 = vld [vmem:[#allocation5 + $0x14] sm:$0xf0] }
  0x4c   : > { %v2425_v35 = vor.u32 %v2860_v32, %v2422_v33  ;;  %v2858_v38 = vld [vmem:[#allocation5 + $0x14] sm:$0xf]  ;;  %v2414_v39 = vld [vmem:[#allocation5 + $0x18] sm:$0xf0]  ;;  %v2413_v40 = vor.u32 %v2859_v37, %v2412_v36  ;;  %v2404_v42 = vld [vmem:[#allocation5] sm:$0xf] }
  0x4d   : > { %v2417_v41 = vor.u32 %v2858_v38, %v2414_v39  ;;  %v2857_v43 = vld [vmem:[#allocation5 + $0x4] sm:$0xf0]  ;;  %v2856_v44 = vld [vmem:[#allocation5 + $0x4] sm:$0xf]  ;;  %v2406_v45 = vld [vmem:[#allocation5 + $0x8] sm:$0xf0] }
  0x4e   : > { %508 = vmatpush.bf16.msra.mxu0 %v2445_v16  ;;  %2971 = vmatpush.bf16.msra.mxu2 %v2445_v16  ;;  %v2405_v46 = vor.u32 %v2857_v43, %v2404_v42  ;;  %v380_v47 = vld [vmem:[%s3564_s21] sm:$0xff]  ;;  %v381_v48 = vld [vmem:[%s3564_s21 + $0x8] sm:$0xff]  ;;  %v2409_v49 = vor.u32 %v2856_v44, %v2406_v45  ;;  %v382_v51 = vld [vmem:[%s3564_s21 + $0x10] sm:$0xff]  ;;  %s3968_s15 = scalar_lea.vmem [#allocation13], %s2395_s1  ;;  %s2968_s28 = sshll.u32 %s3460_s8, 7 }
  0x4f   : > { %557 = vmatpush.bf16.msra.mxu1 %v2449_v17  ;;  %2979 = vmatpush.bf16.msra.mxu3 %v2449_v17  ;;  %v396_v50 = vpack.c.bf16 %v381_v48, %v380_v47  ;;  %v383_v52 = vld [vmem:[%s3564_s21 + $0x18] sm:$0xff]  ;;  %v388_v54 = vld [vmem:[%s3564_s21 + $0x40] sm:$0xff]  ;;  %v389_v55 = vld [vmem:[%s3564_s21 + $0x48] sm:$0xff]  ;;  %s2258_s17 = scalar_lea.hbm %s4041_s7, %s2968_s28  ;;  %s2259_s22 = sshll.u32 %s3968_s15, 4  ;;  %s2260_s22 = int_to_ptr.vmem [resolvable:$true] %s2259_s22 }
  0x50   : > { %v397_v53 = vpack.c.bf16 %v383_v52, %v382_v51  ;;  %v400_v56 = vpack.c.bf16 %v389_v55, %v388_v54  ;;  %v2580_v57 = vld [vmem:[#allocation8 + $0xe0] sm:$0xf]  ;;  %v2902_v58 = vld [vmem:[#allocation8 + $0xec] sm:$0xf0]  ;;  %v2900_v1 = vld [vmem:[#allocation8 + $0xe4] sm:$0xf] }
  0x51   : > { %v2708_v59 = vld [vmem:[#allocation8 + $0x1e0] sm:$0xf]  ;;  %v2934_v60 = vld [vmem:[#allocation8 + $0x1ec] sm:$0xf0]  ;;  %v2581_v61 = vor.u32 %v2902_v58, %v2580_v57  ;;  %v2582_v2 = vld [vmem:[#allocation8 + $0xf0] sm:$0xf0] }
  0x52   : > { %509 = vmatpush.bf16.msra.mxu0 %v2437_v22  ;;  %2972 = vmatpush.bf16.msra.mxu2 %v2437_v22  ;;  %v2709_v62 = vor.u32 %v2934_v60, %v2708_v59  ;;  %v2564_v63 = vld [vmem:[#allocation8 + $0xc0] sm:$0xf]  ;;  %v2898_v0 = vld [vmem:[#allocation8 + $0xcc] sm:$0xf0]  ;;  %v2585_v4 = vor.u32 %v2900_v1, %v2582_v2  ;;  %v2932_v7 = vld [vmem:[#allocation8 + $0x1e4] sm:$0xf] }
  0x53   : > { %558 = vmatpush.bf16.msra.mxu1 %v2441_v23  ;;  %2980 = vmatpush.bf16.msra.mxu3 %v2441_v23  ;;  %v2565_v3 = vor.u32 %v2898_v0, %v2564_v63  ;;  %v2692_v5 = vld [vmem:[#allocation8 + $0x1c0] sm:$0xf]  ;;  %v2930_v6 = vld [vmem:[#allocation8 + $0x1cc] sm:$0xf0]  ;;  %v2710_v9 = vld [vmem:[#allocation8 + $0x1f0] sm:$0xf0] }
  0x54   : > { %v2693_v8 = vor.u32 %v2930_v6, %v2692_v5  ;;  %v2548_v10 = vld [vmem:[#allocation8 + $0xa0] sm:$0xf]  ;;  %v2894_v11 = vld [vmem:[#allocation8 + $0xac] sm:$0xf0]  ;;  %v2713_v12 = vor.u32 %v2932_v7, %v2710_v9  ;;  %v2896_v13 = vld [vmem:[#allocation8 + $0xc4] sm:$0xf] }
  0x55   : > { %v2566_v14 = vld [vmem:[#allocation8 + $0xd0] sm:$0xf0]  ;;  %v2676_v15 = vld [vmem:[#allocation8 + $0x1a0] sm:$0xf]  ;;  %v2926_v17 = vld [vmem:[#allocation8 + $0x1ac] sm:$0xf0]  ;;  %v2549_v22 = vor.u32 %v2894_v11, %v2548_v10 }
  0x56   : > { %510 = vmatpush.bf16.msra.mxu0 %v2429_v28  ;;  %2973 = vmatpush.bf16.msra.mxu2 %v2429_v28  ;;  %v2569_v16 = vor.u32 %v2896_v13, %v2566_v14  ;;  %v2928_v18 = vld [vmem:[#allocation8 + $0x1c4] sm:$0xf]  ;;  %v2694_v19 = vld [vmem:[#allocation8 + $0x1d0] sm:$0xf0]  ;;  %v2677_v23 = vor.u32 %v2926_v17, %v2676_v15  ;;  %v2890_v30 = vld [vmem:[#allocation8 + $0x8c] sm:$0xf0] }
  0x57   : > { %559 = vmatpush.bf16.msra.mxu1 %v2433_v29  ;;  %2981 = vmatpush.bf16.msra.mxu3 %v2433_v29  ;;  %v384_v20 = vld [vmem:[%s3564_s21 + $0x20] sm:$0xff]  ;;  %v385_v21 = vld [vmem:[%s3564_s21 + $0x28] sm:$0xff]  ;;  %v2697_v24 = vor.u32 %v2928_v18, %v2694_v19  ;;  %v390_v26 = vld [vmem:[%s3564_s21 + $0x50] sm:$0xff]  ;;  %s2261_s23 = sshll.u32 %s2258_s17, 4  ;;  %s2247_s8 = scalar_lea.sflag [#allocation4], %s3558_s20  ;;  %s2262_s23 = int_to_ptr.hbm [resolvable:$true] %s2261_s23 }
  0x58   : > { %v398_v25 = vpack.c.bf16 %v385_v21, %v384_v20  ;;  %v391_v27 = vld [vmem:[%s3564_s21 + $0x58] sm:$0xff]  ;;  %v2532_v29 = vld [vmem:[#allocation8 + $0x80] sm:$0xf]  ;;  %v2892_v31 = vld [vmem:[#allocation8 + $0xa4] sm:$0xf]  ;;  %s3317_s14 = sshra.s32 %s2262_s23, 4  ;;  %s3318_s14 = int_to_ptr.hbm [resolvable:$true] %s3317_s14 }
  0x59   : > { %v401_v28 = vpack.c.bf16 %v391_v27, %v390_v26  ;;  %v2533_v32 = vor.u32 %v2890_v30, %v2532_v29  ;;  %v2550_v33 = vld [vmem:[#allocation8 + $0xb0] sm:$0xf0]  ;;  %v2924_v38 = vld [vmem:[#allocation8 + $0x1a4] sm:$0xf]  ;;  %v2886_v42 = vld [vmem:[#allocation8 + $0x6c] sm:$0xf0]  ;;  %p3324_p5 = scmp.lt.s32.totalorder %s3318_s14, %s4041_s7 }
  0x5a   : > { %511 = vmatpush.bf16.msra.mxu0 %v2421_v34  ;;  %2974 = vmatpush.bf16.msra.mxu2 %v2421_v34  ;;  %v2660_v34 = vld [vmem:[#allocation8 + $0x180] sm:$0xf]  ;;  %v2553_v36 = vor.u32 %v2892_v31, %v2550_v33  ;;  %v2678_v39 = vld [vmem:[#allocation8 + $0x1b0] sm:$0xf0]  ;;  %v2888_v43 = vld [vmem:[#allocation8 + $0x84] sm:$0xf] }
  0x5b   : > { %560 = vmatpush.bf16.msra.mxu1 %v2425_v35  ;;  %2982 = vmatpush.bf16.msra.mxu3 %v2425_v35  ;;  %v2922_v35 = vld [vmem:[#allocation8 + $0x18c] sm:$0xf0]  ;;  %v2534_v44 = vld [vmem:[#allocation8 + $0x90] sm:$0xf0]  ;;  %v2920_v51 = vld [vmem:[#allocation8 + $0x184] sm:$0xf] }
  0x5c   : > { %v2661_v37 = vor.u32 %v2922_v35, %v2660_v34  ;;  %v386_v45 = vld [vmem:[%s3564_s21 + $0x30] sm:$0xff]  ;;  %v2537_v48 = vor.u32 %v2888_v43, %v2534_v44  ;;  %v2500_v54 = vld [vmem:[#allocation8 + $0x40] sm:$0xf]  ;;  %v2884_v57 = vld [vmem:[#allocation8 + $0x64] sm:$0xf]  ;;  %s3319_s12 = scalar_lea.hbm %s3318_s14, 128 }
  0x5d   : > { %v2882_v55 = vld [vmem:[#allocation8 + $0x4c] sm:$0xf0]  ;;  %v2518_v58 = vld [vmem:[#allocation8 + $0x70] sm:$0xf0]  ;;  %v2628_v59 = vld [vmem:[#allocation8 + $0x140] sm:$0xf]  ;;  %p3320_p1 = scmp.ne.s32.totalorder %s3318_s14, %s3319_s12 }
  0x5e   : > { %512 = vmatpush.bf16.msra.mxu0 %v2413_v40  ;;  %2975 = vmatpush.bf16.msra.mxu2 %v2413_v40  ;;  %v2516_v40 = vld [vmem:[#allocation8 + $0x60] sm:$0xf]  ;;  %v2501_v60 = vor.u32 %v2882_v55, %v2500_v54  ;;  %v2646_v63 = vld [vmem:[#allocation8 + $0x170] sm:$0xf0]  ;;  %v2521_v0 = vor.u32 %v2884_v57, %v2518_v58  ;;  %v393_v6 = vld [vmem:[%s3564_s21 + $0x68] sm:$0xff] }
  0x5f   : > { %561 = vmatpush.bf16.msra.mxu1 %v2417_v41  ;;  %2983 = vmatpush.bf16.msra.mxu3 %v2417_v41  ;;  %v2681_v41 = vor.u32 %v2924_v38, %v2678_v39  ;;  %v2517_v47 = vor.u32 %v2886_v42, %v2516_v40  ;;  %v2484_v2 = vld [vmem:[#allocation8 + $0x20] sm:$0xf]  ;;  %v2502_v9 = vld [vmem:[#allocation8 + $0x50] sm:$0xf0]  ;;  %v2910_v20 = vld [vmem:[#allocation8 + $0x12c] sm:$0xf0]  ;;  %p3321_p3 = pnand %p3320_p1, %p3524_p12 }
  0x60   : > { %v392_v5 = vld [vmem:[%s3564_s21 + $0x60] sm:$0xff]  ;;  %v394_v13 = vld [vmem:[%s3564_s21 + $0x70] sm:$0xff]  ;;  %v395_v14 = vld [vmem:[%s3564_s21 + $0x78] sm:$0xff] }
  0x61   : > { %v402_v11 = vpack.c.bf16 %v393_v6, %v392_v5  ;;  %v403_v15 = vpack.c.bf16 %v395_v14, %v394_v13  ;;  %v2630_v17 = vld [vmem:[#allocation8 + $0x150] sm:$0xf0]  ;;  %v2612_v19 = vld [vmem:[#allocation8 + $0x120] sm:$0xf]  ;;  %v2872_v33 = vld [vmem:[#allocation8 + $0x4] sm:$0xf]  ;;  %p3322_p11 = pneg %p3321_p3 }
  0x62   : > { %513 = vmatpush.bf16.msra.mxu0 %v2405_v46  ;;  %2976 = vmatpush.bf16.msra.mxu2 %v2405_v46  ;;  %v387_v46 = vld [vmem:[%s3564_s21 + $0x38] sm:$0xff]  ;;  %v2468_v21 = vld [vmem:[#allocation8] sm:$0xf]  ;;  %v2588_v40 = vld [vmem:[#allocation8 + $0xe8] sm:$0xf]  ;;  %s3323_s21 = scalar_lea.hbm %s4041_s7, 512 }
  0x63   : > { %562 = vmatpush.bf16.msra.mxu1 %v2409_v49  ;;  %2984 = vmatpush.bf16.msra.mxu3 %v2409_v49  ;;  %v2644_v49 = vld [vmem:[#allocation8 + $0x160] sm:$0xf]  ;;  %v2614_v29 = vld [vmem:[#allocation8 + $0x130] sm:$0xf0]  ;;  %v2716_v43 = vld [vmem:[#allocation8 + $0x1e8] sm:$0xf]  ;;  %p3325_p6 = scmp.lt.s32.totalorder %s3323_s21, %s3319_s12 }
  0x64   : > { %v2596_v31 = vld [vmem:[#allocation8 + $0x100] sm:$0xf]  ;;  %v2470_v35 = vld [vmem:[#allocation8 + $0x10] sm:$0xf0]  ;;  %v2935_v44 = vld [vmem:[#allocation8 + $0x1f4] sm:$0xf0] }
  0x65   : > { %514 = vmatmul.bf16.vlgmr.msra.gmra.mxu0 %v396_v50  ;;  %534 = vmatmul.bf16.vlgmr.msra.gmra.mxu2 %v400_v56  ;;  %v2473_v38 = vor.u32 %v2872_v33, %v2470_v35  ;;  %v2572_v54 = vld [vmem:[#allocation8 + $0xc8] sm:$0xf]  ;;  %v2899_v55 = vld [vmem:[#allocation8 + $0xd4] sm:$0xf0]  ;;  %v2929_v14 = vld [vmem:[#allocation8 + $0x1cc] sm:$0xf]  ;;  %p3326_p7 = por %p3325_p6, %p3324_p5 }
  0x66   : > { %563 = vmatmul.bf16.vlgmr.msra.gmra.mxu1 %v396_v50  ;;  %583 = vmatmul.bf16.vlgmr.msra.gmra.mxu3 %v400_v56  ;;  %v2918_v50 = vld [vmem:[#allocation8 + $0x16c] sm:$0xf0]  ;;  %v2573_v57 = vor.u32 %v2899_v55, %v2572_v54  ;;  %v2670_v54 = vld [vmem:[#allocation8 + $0x198] sm:$0xf0] }
  0x67   : > { %1046 = vmatpush.bf16.msrb.mxu2 %v2581_v61  ;;  %1095 = vmatpush.bf16.msrb.mxu3 %v2709_v62  ;;  %v2645_v52 = vor.u32 %v2918_v50, %v2644_v49  ;;  %v2914_v61 = vld [vmem:[#allocation8 + $0x14c] sm:$0xf0]  ;;  %v2916_v62 = vld [vmem:[#allocation8 + $0x164] sm:$0xf]  ;;  %v2933_v49 = vld [vmem:[#allocation8 + $0x1ec] sm:$0xf]  ;;  %p3327_p8 = pnand %p3326_p7, %p3322_p11 }
  0x68   : > { %1144 = vmatpush.bf16.msrb.mxu0 %v2585_v4  ;;  %1193 = vmatpush.bf16.msrb.mxu1 %v2713_v12  ;;  %v2629_v1 = vor.u32 %v2914_v61, %v2628_v59  ;;  %v399_v4 = vpack.c.bf16 %v387_v46, %v386_v45  ;;  %v2649_v7 = vor.u32 %v2916_v62, %v2646_v63  ;;  %v2901_v45 = vld [vmem:[#allocation8 + $0xec] sm:$0xf]  ;;  %v2718_v50 = vld [vmem:[#allocation8 + $0x1f8] sm:$0xf0]  ;;  %v2931_v61 = vld [vmem:[#allocation8 + $0x1d4] sm:$0xf0] }
  0x69   : > { %v2717_v46 = vor.u32 %v2935_v44, %v2716_v43  ;;  %v2897_v63 = vld [vmem:[#allocation8 + $0xcc] sm:$0xf]  ;;  %v2540_v44 = vld [vmem:[#allocation8 + $0x88] sm:$0xf] }
  0x6b   : > { %1047 = vmatpush.bf16.msrb.mxu2 %v2565_v3  ;;  %1096 = vmatpush.bf16.msrb.mxu3 %v2693_v8  ;;  %v2878_v3 = vld [vmem:[#allocation8 + $0x2c] sm:$0xf0]  ;;  %v2880_v8 = vld [vmem:[#allocation8 + $0x44] sm:$0xf] }
  0x6c   : > { %1145 = vmatpush.bf16.msrb.mxu0 %v2569_v16  ;;  %1194 = vmatpush.bf16.msrb.mxu1 %v2697_v24  ;;  %v2485_v10 = vor.u32 %v2878_v3, %v2484_v2  ;;  %v2505_v12 = vor.u32 %v2880_v8, %v2502_v9  ;;  %v2912_v16 = vld [vmem:[#allocation8 + $0x144] sm:$0xf] }
  0x6d   : > { %v2633_v18 = vor.u32 %v2912_v16, %v2630_v17  ;;  %v2876_v24 = vld [vmem:[#allocation8 + $0x24] sm:$0xf] }
  0x6f   : > { %1048 = vmatpush.bf16.msrb.mxu2 %v2549_v22  ;;  %1097 = vmatpush.bf16.msrb.mxu3 %v2677_v23  ;;  %v2613_v22 = vor.u32 %v2910_v20, %v2612_v19  ;;  %v2874_v23 = vld [vmem:[#allocation8 + $0xc] sm:$0xf0]  ;;  %v2895_v19 = vld [vmem:[#allocation8 + $0xb4] sm:$0xf0] }
  0x70   : > { %1146 = vmatpush.bf16.msrb.mxu0 %v2553_v36  ;;  %1195 = vmatpush.bf16.msrb.mxu1 %v2681_v41  ;;  %v2469_v26 = vor.u32 %v2874_v23, %v2468_v21  ;;  %v2904_v36 = vld [vmem:[#allocation8 + $0x104] sm:$0xf]  ;;  %v2903_v41 = vld [vmem:[#allocation8 + $0xf4] sm:$0xf0] }
  0x71   : > { %v2589_v42 = vor.u32 %v2903_v41, %v2588_v40  ;;  %v2927_v23 = vld [vmem:[#allocation8 + $0x1b4] sm:$0xf0]  ;;  %v2925_v40 = vld [vmem:[#allocation8 + $0x1ac] sm:$0xf]  ;;  %v2686_v41 = vld [vmem:[#allocation8 + $0x1b8] sm:$0xf0] }
  0x73   : > { %1049 = vmatpush.bf16.msrb.mxu2 %v2533_v32  ;;  %1098 = vmatpush.bf16.msrb.mxu3 %v2661_v37  ;;  %v2906_v32 = vld [vmem:[#allocation8 + $0x10c] sm:$0xf0]  ;;  %v2598_v37 = vld [vmem:[#allocation8 + $0x110] sm:$0xf0] }
  0x74   : > { %1147 = vmatpush.bf16.msrb.mxu0 %v2537_v48  ;;  %v2597_v34 = vor.u32 %v2906_v32, %v2596_v31  ;;  %v2601_v39 = vor.u32 %v2904_v36, %v2598_v37 }
  0x75   : > { %519 = vmatmul.bf16.gmra.mxu0 %v397_v53  ;;  %539 = vmatmul.bf16.gmra.mxu2 %v401_v28 }
  0x76   : > { %568 = vmatmul.bf16.gmra.mxu1 %v397_v53  ;;  %588 = vmatmul.bf16.gmra.mxu3 %v401_v28  ;;  %v2662_v53 = vld [vmem:[#allocation8 + $0x190] sm:$0xf0]  ;;  %v2908_v28 = vld [vmem:[#allocation8 + $0x124] sm:$0xf] }
  0x77   : > { %v2665_v56 = vor.u32 %v2920_v51, %v2662_v53  ;;  %1050 = vmatpush.bf16.msrb.mxu2 %v2517_v47  ;;  %1099 = vmatpush.bf16.msrb.mxu3 %v2645_v52  ;;  %v2617_v30 = vor.u32 %v2908_v28, %v2614_v29  ;;  %v2590_v47 = vld [vmem:[#allocation8 + $0xf8] sm:$0xf0]  ;;  %v2721_v51 = vor.u32 %v2933_v49, %v2718_v50  ;;  %v2923_v49 = vld [vmem:[#allocation8 + $0x194] sm:$0xf0]  ;;  %v2889_v50 = vld [vmem:[#allocation8 + $0x8c] sm:$0xf] }
  0x78   : > { %1148 = vmatpush.bf16.msrb.mxu0 %v2521_v0  ;;  %v2593_v48 = vor.u32 %v2901_v45, %v2590_v47  ;;  %v420_v52 = vld [vmem:[#allocation7] sm:$0x3]  ;;  %v2891_v45 = vld [vmem:[#allocation8 + $0x94] sm:$0xf0] }
  0x79   : > { %1196 = vmatpush.bf16.msrb.mxu1 %v2665_v56  ;;  %v3598_v58 = vperm.slane %v420_v52, 0  ;;  %v3600_v59 = vperm.slane %v420_v52, 1  ;;  %v2574_v0 = vld [vmem:[#allocation8 + $0xd8] sm:$0xf0]  ;;  %v2541_v47 = vor.u32 %v2891_v45, %v2540_v44  ;;  %v2636_v44 = vld [vmem:[#allocation8 + $0x148] sm:$0xf] }
  0x7a   : > { %v2542_v52 = vld [vmem:[#allocation8 + $0x98] sm:$0xf0] }
  0x7b   : > { %1051 = vmatpush.bf16.msrb.mxu2 %v2501_v60  ;;  %1100 = vmatpush.bf16.msrb.mxu3 %v2629_v1  ;;  %v2700_v60 = vld [vmem:[#allocation8 + $0x1c8] sm:$0xf]  ;;  %v2577_v1 = vor.u32 %v2897_v63, %v2574_v0  ;;  %v2545_v55 = vor.u32 %v2889_v50, %v2542_v52  ;;  %v2913_v52 = vld [vmem:[#allocation8 + $0x14c] sm:$0xf] }
  0x7c   : > { %1149 = vmatpush.bf16.msrb.mxu0 %v2505_v12  ;;  %v2701_v62 = vor.u32 %v2931_v61, %v2700_v60 }
  0x7d   : > { %1197 = vmatpush.bf16.msrb.mxu1 %v2649_v7 }
  0x7f   : > { %1052 = vmatpush.bf16.msrb.mxu2 %v2485_v10  ;;  %1101 = vmatpush.bf16.msrb.mxu3 %v2613_v22  ;;  %v2684_v22 = vld [vmem:[#allocation8 + $0x1a8] sm:$0xf] }
  0x81   : > { %1198 = vmatpush.bf16.msrb.mxu1 %v2633_v18  ;;  %v2556_v18 = vld [vmem:[#allocation8 + $0xa8] sm:$0xf] }
  0x82   : > { %v2557_v21 = vor.u32 %v2895_v19, %v2556_v18  ;;  %v2885_v18 = vld [vmem:[#allocation8 + $0x6c] sm:$0xf]  ;;  %v2526_v19 = vld [vmem:[#allocation8 + $0x78] sm:$0xf0] }
  0x83   : > { %1053 = vmatpush.bf16.msrb.mxu2 %v2469_v26  ;;  %1102 = vmatpush.bf16.msrb.mxu3 %v2597_v34  ;;  %v2558_v26 = vld [vmem:[#allocation8 + $0xb8] sm:$0xf0] }
  0x85   : > { %524 = vmatmul.bf16.gmra.mxu0 %v398_v25  ;;  %544 = vmatmul.bf16.gmra.mxu2 %v402_v11 }
  0x86   : > { %573 = vmatmul.bf16.gmra.mxu1 %v398_v25  ;;  %593 = vmatmul.bf16.gmra.mxu3 %v402_v11  ;;  %v2486_v25 = vld [vmem:[#allocation8 + $0x30] sm:$0xf0] }
  0x87   : > { %v2489_v27 = vor.u32 %v2876_v24, %v2486_v25  ;;  %1199 = vmatpush.bf16.msrb.mxu1 %v2617_v30  ;;  %1242 = vmatpush.bf16.msra.mxu2 %v2589_v42  ;;  %v2685_v24 = vor.u32 %v2927_v23, %v2684_v22  ;;  %v2893_v25 = vld [vmem:[#allocation8 + $0xac] sm:$0xf]  ;;  %v2689_v42 = vor.u32 %v2925_v40, %v2686_v41  ;;  %v2654_v23 = vld [vmem:[#allocation8 + $0x178] sm:$0xf0] }
  0x88   : > { %1291 = vmatpush.bf16.msra.mxu3 %v2717_v46  ;;  %v2917_v22 = vld [vmem:[#allocation8 + $0x16c] sm:$0xf] }
  0x89   : > { %1150 = vmatpush.bf16.msrb.mxu0 %v2489_v27  ;;  %v2561_v27 = vor.u32 %v2893_v25, %v2558_v26 }
  0x8b   : > { %1200 = vmatpush.bf16.msrb.mxu1 %v2601_v39  ;;  %1243 = vmatpush.bf16.msra.mxu2 %v2573_v57 }
  0x8c   : > { %1292 = vmatpush.bf16.msra.mxu3 %v2701_v62 }
  0x8d   : > { %1151 = vmatpush.bf16.msrb.mxu0 %v2473_v38 }
  0x8f   : > { %1389 = vmatpush.bf16.msra.mxu1 %v2721_v51  ;;  %1244 = vmatpush.bf16.msra.mxu2 %v2557_v21  ;;  %v2529_v21 = vor.u32 %v2885_v18, %v2526_v19  ;;  %v2909_v18 = vld [vmem:[#allocation8 + $0x12c] sm:$0xf]  ;;  %v2622_v19 = vld [vmem:[#allocation8 + $0x138] sm:$0xf0] }
  0x90   : > { %1293 = vmatpush.bf16.msra.mxu3 %v2685_v24  ;;  %v2657_v24 = vor.u32 %v2917_v22, %v2654_v23 }
  0x91   : > { %1340 = vmatpush.bf16.msra.mxu0 %v2593_v48  ;;  %v2668_v48 = vld [vmem:[#allocation8 + $0x188] sm:$0xf] }
  0x92   : > { %v2669_v51 = vor.u32 %v2923_v49, %v2668_v48  ;;  %v2881_v48 = vld [vmem:[#allocation8 + $0x4c] sm:$0xf]  ;;  %v2510_v49 = vld [vmem:[#allocation8 + $0x58] sm:$0xf0] }
  0x93   : > { %1245 = vmatpush.bf16.msra.mxu2 %v2541_v47  ;;  %v2915_v47 = vld [vmem:[#allocation8 + $0x154] sm:$0xf0] }
  0x94   : > { %1294 = vmatpush.bf16.msra.mxu3 %v2669_v51  ;;  %v2637_v50 = vor.u32 %v2915_v47, %v2636_v44  ;;  %v2513_v51 = vor.u32 %v2881_v48, %v2510_v49  ;;  %v2873_v44 = vld [vmem:[#allocation8 + $0xc] sm:$0xf]  ;;  %v2606_v49 = vld [vmem:[#allocation8 + $0x118] sm:$0xf0] }
  0x95   : > { %529 = vmatmul.bf16.gmra.mxu0 %v399_v4  ;;  %549 = vmatmul.bf16.gmra.mxu2 %v403_v15  ;;  %v2905_v48 = vld [vmem:[#allocation8 + $0x10c] sm:$0xf] }
  0x96   : > { %578 = vmatmul.bf16.gmra.mxu1 %v399_v4  ;;  %598 = vmatmul.bf16.gmra.mxu3 %v403_v15  ;;  %v2702_v15 = vld [vmem:[#allocation8 + $0x1d8] sm:$0xf0] }
  0x97   : > { %1341 = vmatpush.bf16.msra.mxu0 %v2577_v1  ;;  %v2705_v16 = vor.u32 %v2929_v14, %v2702_v15  ;;  %v2652_v14 = vld [vmem:[#allocation8 + $0x168] sm:$0xf] }
  0x99   : > { %1390 = vmatpush.bf16.msra.mxu1 %v2705_v16 }
  0x9b   : > { %1342 = vmatpush.bf16.msra.mxu0 %v2561_v27 }
  0x9d   : > { %1391 = vmatpush.bf16.msra.mxu1 %v2689_v42  ;;  %v2508_v42 = vld [vmem:[#allocation8 + $0x48] sm:$0xf] }
  0x9f   : > { %1343 = vmatpush.bf16.msra.mxu0 %v2545_v55 }
  0xa3   : > { %1344 = vmatpush.bf16.msra.mxu0 %v2529_v21 }
  0xa7   : > { %1345 = vmatpush.bf16.msra.mxu0 %v2513_v51 }
  0xe2   : > { %v515_v53 = vpop.f32.mrf.mxu0 }
  0xe3   : > { %v564_v56 = vpop.f32.mrf.mxu1  ;;  %v516_v2 = vadd.f32 %v515_v53, %v3598_v58  ;;  %v2921_v53 = vld [vmem:[#allocation8 + $0x18c] sm:$0xf] }
  0xe4   : > { %v565_v3 = vadd.f32 %v564_v56, %v3600_v59  ;;  %v2673_v56 = vor.u32 %v2921_v53, %v2670_v54  ;;  %v2638_v53 = vld [vmem:[#allocation8 + $0x158] sm:$0xf0] }
  0xe5   : > { %v604_v8 = vmax.f32 %v516_v2, 0.0  ;;  %v2641_v54 = vor.u32 %v2913_v52, %v2638_v53 }
  0xe6   : > { %v605_v10 = vmax.f32 %v565_v3, 0.0  ;;  %1392 = vmatpush.bf16.msra.mxu1 %v2673_v56 }
  0xea   : > { %v517_v4 = vpop.f32.mrf.mxu0  ;;  %1393 = vmatpush.bf16.msra.mxu1 %v2657_v24 }
  0xeb   : > { %v518_v5 = vadd.f32 %v517_v4, %v3598_v58  ;;  %v566_v6 = vpop.f32.mrf.mxu1 }
  0xec   : > { %v567_v7 = vadd.f32 %v566_v6, %v3600_v59 }
  0xed   : > { %v606_v9 = vmax.f32 %v518_v5, 0.0  ;;  %v535_v5 = vpop.f32.mrf.mxu2 }
  0xee   : > { %v607_v11 = vmax.f32 %v567_v7, 0.0  ;;  %v584_v7 = vpop.f32.mrf.mxu3  ;;  %v536_v55 = vadd.f32 %v535_v5, %v3598_v58  ;;  %1394 = vmatpush.bf16.msra.mxu1 %v2641_v54  ;;  %v2492_v5 = vld [vmem:[#allocation8 + $0x28] sm:$0xf] }
  0xef   : > { %v3606_v12 = vpack.c.bf16 %v606_v9, %v604_v8 }
  0xf0   : > { %v3608_v13 = vpack.c.bf16 %v607_v11, %v605_v10  ;;  %v2524_v10 = vld [vmem:[#allocation8 + $0x68] sm:$0xf]  ;;  %v2887_v11 = vld [vmem:[#allocation8 + $0x74] sm:$0xf0] }
  0xf1   : > { %1054 = vmatmul.bf16.vlgmr.msrb.gmra.mxu2 %v3606_v12  ;;  %1152 = vmatmul.bf16.vlgmr.msrb.gmra.mxu0 %v3606_v12  ;;  %v2525_v16 = vor.u32 %v2887_v11, %v2524_v10  ;;  %v2911_v11 = vld [vmem:[#allocation8 + $0x134] sm:$0xf0] }
  0xf2   : > { %1103 = vmatmul.bf16.vlgmr.msrb.gmra.mxu3 %v3608_v13  ;;  %1201 = vmatmul.bf16.vlgmr.msrb.gmra.mxu1 %v3608_v13  ;;  %v520_v17 = vpop.f32.mrf.mxu0 }
  0xf3   : > { %v569_v20 = vpop.f32.mrf.mxu1  ;;  %v521_v28 = vadd.f32 %v520_v17, %v3598_v58  ;;  %v2919_v17 = vld [vmem:[#allocation8 + $0x174] sm:$0xf0]  ;;  %1246 = vmatpush.bf16.msra.mxu2 %v2525_v16 }
  0xf4   : > { %v570_v29 = vadd.f32 %v569_v20, %v3600_v59  ;;  %v2653_v20 = vor.u32 %v2919_v17, %v2652_v14  ;;  %v2877_v14 = vld [vmem:[#allocation8 + $0x2c] sm:$0xf] }
  0xf5   : > { %v608_v34 = vmax.f32 %v521_v28, 0.0  ;;  %v537_v25 = vpop.f32.mrf.mxu2 }
  0xf6   : > { %v609_v36 = vmax.f32 %v570_v29, 0.0  ;;  %1295 = vmatpush.bf16.msra.mxu3 %v2653_v20  ;;  %v586_v27 = vpop.f32.mrf.mxu3  ;;  %v538_v56 = vadd.f32 %v537_v25, %v3598_v58  ;;  %v2625_v20 = vor.u32 %v2909_v18, %v2622_v19 }
  0xf8   : > { %1395 = vmatpush.bf16.msra.mxu1 %v2625_v20  ;;  %v2959_v20 = vld [vmem:[#allocation11 + $0xb8] sm:$0xff] }
  0xfa   : > { %v522_v30 = vpop.f32.mrf.mxu0  ;;  %1296 = vmatpush.bf16.msra.mxu3 %v2637_v50  ;;  %v2609_v50 = vor.u32 %v2905_v48, %v2606_v49 }
  0xfb   : > { %v523_v31 = vadd.f32 %v522_v30, %v3598_v58  ;;  %v571_v32 = vpop.f32.mrf.mxu1 }
  0xfc   : > { %v572_v33 = vadd.f32 %v571_v32, %v3600_v59  ;;  %1396 = vmatpush.bf16.msra.mxu1 %v2609_v50 }
  0xfd   : > { %v610_v35 = vmax.f32 %v523_v31, 0.0  ;;  %v540_v41 = vpop.f32.mrf.mxu2 }
  0xfe   : > { %v611_v37 = vmax.f32 %v572_v33, 0.0  ;;  %v589_v45 = vpop.f32.mrf.mxu3  ;;  %v541_v22 = vadd.f32 %v540_v41, %v3598_v58  ;;  %v2604_v41 = vld [vmem:[#allocation8 + $0x108] sm:$0xf] }
  0xff   : > { %v3618_v38 = vpack.c.bf16 %v610_v35, %v608_v34  ;;  %v590_v25 = vadd.f32 %v589_v45, %v3600_v59  ;;  %v2478_v45 = vld [vmem:[#allocation8 + $0x18] sm:$0xf0] }
 0x100   : > { %v3620_v39 = vpack.c.bf16 %v611_v37, %v609_v36  ;;  %v2481_v47 = vor.u32 %v2873_v44, %v2478_v45 }
 0x101   : > { %1059 = vmatmul.bf16.gmra.mxu2 %v3618_v38  ;;  %1157 = vmatmul.bf16.gmra.mxu0 %v3618_v38 }
 0x102   : > { %1108 = vmatmul.bf16.gmra.mxu3 %v3620_v39  ;;  %1206 = vmatmul.bf16.gmra.mxu1 %v3620_v39  ;;  %v525_v43 = vpop.f32.mrf.mxu0 }
 0x103   : > { %v574_v46 = vpop.f32.mrf.mxu1  ;;  %v526_v57 = vadd.f32 %v525_v43, %v3598_v58  ;;  %v2883_v43 = vld [vmem:[#allocation8 + $0x54] sm:$0xf0] }
 0x104   : > { %v575_v60 = vadd.f32 %v574_v46, %v3600_v59  ;;  %v2509_v46 = vor.u32 %v2883_v43, %v2508_v42  ;;  %v2907_v43 = vld [vmem:[#allocation8 + $0x114] sm:$0xf0] }
 0x105   : > { %v612_v1 = vmax.f32 %v526_v57, 0.0  ;;  %v585_v57 = vadd.f32 %v584_v7, %v3600_v59  ;;  %v2879_v7 = vld [vmem:[#allocation8 + $0x34] sm:$0xf0] }
 0x106   : > { %v613_v3 = vmax.f32 %v575_v60, 0.0  ;;  %1247 = vmatpush.bf16.msra.mxu2 %v2509_v46  ;;  %v587_v60 = vadd.f32 %v586_v27, %v3600_v59  ;;  %v2493_v10 = vor.u32 %v2879_v7, %v2492_v5  ;;  %v624_v27 = vmax.f32 %v541_v22, 0.0  ;;  %v2967_v22 = vld [vmem:[#allocation11 + $0xf8] sm:$0xff] }
 0x107   : > { %v2605_v46 = vor.u32 %v2907_v43, %v2604_v41  ;;  %1941 = vmatpush.bf16.msrb.mxu1 %v2967_v22 }
 0x10a   : > { %v527_v61 = vpop.f32.mrf.mxu0  ;;  %1248 = vmatpush.bf16.msra.mxu2 %v2493_v10 }
 0x10b   : > { %v528_v62 = vadd.f32 %v527_v61, %v3598_v58  ;;  %v576_v63 = vpop.f32.mrf.mxu1  ;;  %v620_v61 = vmax.f32 %v536_v55, 0.0 }
 0x10c   : > { %v577_v0 = vadd.f32 %v576_v63, %v3600_v59  ;;  %v621_v63 = vmax.f32 %v585_v57, 0.0 }
 0x10d   : > { %v614_v2 = vmax.f32 %v528_v62, 0.0  ;;  %v622_v62 = vmax.f32 %v538_v56, 0.0 }
 0x10e   : > { %v615_v4 = vmax.f32 %v577_v0, 0.0  ;;  %v623_v0 = vmax.f32 %v587_v60, 0.0 }
 0x10f   : > { %v3630_v6 = vpack.c.bf16 %v614_v2, %v612_v1  ;;  %v542_v1 = vpop.f32.mrf.mxu2  ;;  %v591_v2 = vpop.f32.mrf.mxu3 }
 0x110   : > { %v3632_v8 = vpack.c.bf16 %v615_v4, %v613_v3  ;;  %v3654_v3 = vpack.c.bf16 %v622_v62, %v620_v61  ;;  %v3656_v4 = vpack.c.bf16 %v623_v0, %v621_v63  ;;  %v543_v23 = vadd.f32 %v542_v1, %v3598_v58 }
 0x111   : > { %1064 = vmatmul.bf16.gmra.mxu2 %v3630_v6  ;;  %1162 = vmatmul.bf16.gmra.mxu0 %v3630_v6 }
 0x112   : > { %1113 = vmatmul.bf16.gmra.mxu3 %v3632_v8  ;;  %1211 = vmatmul.bf16.gmra.mxu1 %v3632_v8  ;;  %v530_v9 = vpop.f32.mrf.mxu0 }
 0x113   : > { %v579_v15 = vpop.f32.mrf.mxu1  ;;  %v531_v26 = vadd.f32 %v530_v9, %v3598_v58  ;;  %v2620_v9 = vld [vmem:[#allocation8 + $0x128] sm:$0xf] }
 0x114   : > { %v580_v28 = vadd.f32 %v579_v15, %v3600_v59  ;;  %v2494_v15 = vld [vmem:[#allocation8 + $0x38] sm:$0xf0]  ;;  %v2621_v16 = vor.u32 %v2911_v11, %v2620_v9 }
 0x115   : > { %v616_v33 = vmax.f32 %v531_v26, 0.0  ;;  %v2497_v17 = vor.u32 %v2877_v14, %v2494_v15  ;;  %v592_v26 = vadd.f32 %v591_v2, %v3600_v59 }
 0x116   : > { %v617_v35 = vmax.f32 %v580_v28, 0.0  ;;  %1297 = vmatpush.bf16.msra.mxu3 %v2621_v16  ;;  %v626_v28 = vmax.f32 %v543_v23, 0.0  ;;  %v2942_v23 = vld [vmem:[#allocation11 + $0x30] sm:$0xff] }
 0x117   : > { %v545_v21 = vpop.f32.mrf.mxu2  ;;  %1346 = vmatpush.bf16.msra.mxu0 %v2497_v17  ;;  %v594_v24 = vpop.f32.mrf.mxu3  ;;  %v2943_v17 = vld [vmem:[#allocation11 + $0x38] sm:$0xff] }
 0x118   : > { %v546_v51 = vadd.f32 %v545_v21, %v3598_v58  ;;  %v595_v53 = vadd.f32 %v594_v24, %v3600_v59 }
 0x11a   : > { %v532_v29 = vpop.f32.mrf.mxu0  ;;  %1298 = vmatpush.bf16.msra.mxu3 %v2605_v46  ;;  %v628_v56 = vmax.f32 %v546_v51, 0.0  ;;  %v629_v61 = vmax.f32 %v595_v53, 0.0  ;;  %v2966_v46 = vld [vmem:[#allocation11 + $0xf0] sm:$0xff] }
 0x11b   : > { %v533_v30 = vadd.f32 %v532_v29, %v3598_v58  ;;  %v581_v31 = vpop.f32.mrf.mxu1  ;;  %v625_v29 = vmax.f32 %v590_v25, 0.0  ;;  %1347 = vmatpush.bf16.msra.mxu0 %v2481_v47  ;;  %v2941_v47 = vld [vmem:[#allocation11 + $0x28] sm:$0xff]  ;;  %1942 = vmatpush.bf16.msrb.mxu1 %v2966_v46  ;;  %v2956_v46 = vld [vmem:[#allocation11 + $0xa0] sm:$0xff] }
 0x11c   : > { %v582_v32 = vadd.f32 %v581_v31, %v3600_v59  ;;  %v3666_v31 = vpack.c.bf16 %v626_v28, %v624_v27 }
 0x11d   : > { %v618_v34 = vmax.f32 %v533_v30, 0.0  ;;  %v627_v30 = vmax.f32 %v592_v26, 0.0 }
 0x11e   : > { %v619_v36 = vmax.f32 %v582_v32, 0.0 }
 0x11f   : > { %v3642_v37 = vpack.c.bf16 %v618_v34, %v616_v33  ;;  %v3668_v32 = vpack.c.bf16 %v627_v30, %v625_v29  ;;  %v547_v33 = vpop.f32.mrf.mxu2  ;;  %v596_v34 = vpop.f32.mrf.mxu3  ;;  %1892 = vmatpush.bf16.msrb.mxu0 %v2959_v20  ;;  %v2950_v29 = vld [vmem:[#allocation11 + $0x70] sm:$0xff] }
 0x120   : > { %v3644_v40 = vpack.c.bf16 %v619_v36, %v617_v35  ;;  %v2476_v35 = vld [vmem:[#allocation8 + $0x8] sm:$0xf]  ;;  %v2875_v36 = vld [vmem:[#allocation8 + $0x14] sm:$0xf0]  ;;  %v548_v52 = vadd.f32 %v547_v33, %v3598_v58  ;;  %v597_v54 = vadd.f32 %v596_v34, %v3600_v59 }
 0x121   : > { %1069 = vmatmul.bf16.gmra.mxu2 %v3642_v37  ;;  %1167 = vmatmul.bf16.gmra.mxu0 %v3642_v37  ;;  %v2477_v42 = vor.u32 %v2875_v36, %v2476_v35 }
 0x122   : > { %1118 = vmatmul.bf16.gmra.mxu3 %v3644_v40  ;;  %1216 = vmatmul.bf16.gmra.mxu1 %v3644_v40  ;;  %v630_v57 = vmax.f32 %v548_v52, 0.0  ;;  %v631_v62 = vmax.f32 %v597_v54, 0.0 }
 0x123   : > { %1249 = vmatpush.bf16.msra.mxu2 %v2477_v42 }
 0x124   : > { %v3678_v63 = vpack.c.bf16 %v630_v57, %v628_v56  ;;  %v3680_v0 = vpack.c.bf16 %v631_v62, %v629_v61 }
 0x127   : > { %v550_v55 = vpop.f32.mrf.mxu2  ;;  %v599_v60 = vpop.f32.mrf.mxu3  ;;  %1794 = vmatpush.bf16.msrb.mxu2 %v2943_v17  ;;  %v2940_v17 = vld [vmem:[#allocation11 + $0x20] sm:$0xff] }
 0x128   : > { %v551_v5 = vadd.f32 %v550_v55, %v3598_v58  ;;  %v600_v9 = vadd.f32 %v599_v60, %v3600_v59  ;;  %v2949_v60 = vld [vmem:[#allocation11 + $0x68] sm:$0xff] }
 0x12a   : > { %v632_v11 = vmax.f32 %v551_v5, 0.0  ;;  %v633_v15 = vmax.f32 %v600_v9, 0.0 }
 0x12b   : > { %1795 = vmatpush.bf16.msrb.mxu2 %v2942_v23 }
 0x12f   : > { %v552_v1 = vpop.f32.mrf.mxu2  ;;  %v601_v2 = vpop.f32.mrf.mxu3  ;;  %1796 = vmatpush.bf16.msrb.mxu2 %v2941_v47 }
 0x130   : > { %v553_v7 = vadd.f32 %v552_v1, %v3598_v58  ;;  %v602_v10 = vadd.f32 %v601_v2, %v3600_v59  ;;  %v2951_v58 = vld [vmem:[#allocation11 + $0x78] sm:$0xff] }
 0x131   : > { %1074 = vmatmul.bf16.gmra.mxu2 %v3654_v3  ;;  %1172 = vmatmul.bf16.gmra.mxu0 %v3654_v3  ;;  %v3698_v59 = vld [vmem:[#allocation10] sm:$0xf] }
 0x132   : > { %1123 = vmatmul.bf16.gmra.mxu3 %v3656_v4  ;;  %1221 = vmatmul.bf16.gmra.mxu1 %v3656_v4  ;;  %v634_v14 = vmax.f32 %v553_v7, 0.0  ;;  %v635_v16 = vmax.f32 %v602_v10, 0.0  ;;  %v3701_v21 = vperm.slane %v3698_v59, 1  ;;  %v3707_v28 = vperm.slane %v3698_v59, 0 }
 0x133   : > { %1843 = vmatpush.bf16.msrb.mxu3 %v2951_v58  ;;  %1797 = vmatpush.bf16.msrb.mxu2 %v2940_v17 }
 0x134   : > { %v3690_v18 = vpack.c.bf16 %v634_v14, %v632_v11  ;;  %v3692_v19 = vpack.c.bf16 %v635_v16, %v633_v15  ;;  %v2957_v14 = vld [vmem:[#allocation11 + $0xa8] sm:$0xff] }
 0x135   : > { %v2965_v16 = vld [vmem:[#allocation11 + $0xe8] sm:$0xff] }
 0x136   : > { %1943 = vmatpush.bf16.msrb.mxu1 %v2965_v16  ;;  %v2955_v16 = vld [vmem:[#allocation11 + $0x98] sm:$0xff] }
 0x137   : > { %1844 = vmatpush.bf16.msrb.mxu3 %v2950_v29 }
 0x13b   : > { %1845 = vmatpush.bf16.msrb.mxu3 %v2949_v60 }
 0x141   : > { %1079 = vmatmul.bf16.gmra.mxu2 %v3666_v31  ;;  %1177 = vmatmul.bf16.gmra.mxu0 %v3666_v31 }
 0x142   : > { %1128 = vmatmul.bf16.gmra.mxu3 %v3668_v32  ;;  %1226 = vmatmul.bf16.gmra.mxu1 %v3668_v32 }
 0x151   : > { %1084 = vmatmul.bf16.gmra.mxu2 %v3678_v63  ;;  %1182 = vmatmul.bf16.gmra.mxu0 %v3678_v63 }
 0x152   : > { %1133 = vmatmul.bf16.gmra.mxu3 %v3680_v0  ;;  %1231 = vmatmul.bf16.gmra.mxu1 %v3680_v0 }
 0x161   : > { %1089 = vmatmul.bf16.gmra.mxu2 %v3690_v18  ;;  %1187 = vmatmul.bf16.gmra.mxu0 %v3690_v18 }
 0x162   : > { %1138 = vmatmul.bf16.gmra.mxu3 %v3692_v19  ;;  %1236 = vmatmul.bf16.gmra.mxu1 %v3692_v19 }
 0x16e   : > { %v1153_v24 = vpop.f32.mrf.mxu0 }
 0x16f   : > { %v1154_v25 = vadd.f32 %v1153_v24, %v3701_v21  ;;  %v1202_v26 = vpop.f32.mrf.mxu1 }
 0x171   : > { %v1203_v27 = vadd.f32 %v1202_v26, %v1154_v25  ;;  %1250 = vmatmul.bf16.vlgmr.msra.gmra.mxu2 %v3606_v12  ;;  %1348 = vmatmul.bf16.vlgmr.msra.gmra.mxu0 %v3606_v12  ;;  %v2958_v12 = vld [vmem:[#allocation11 + $0xb0] sm:$0xff] }
 0x172   : > { %1299 = vmatmul.bf16.vlgmr.msra.gmra.mxu3 %v3608_v13  ;;  %1397 = vmatmul.bf16.vlgmr.msra.gmra.mxu1 %v3608_v13 }
 0x173   : > { %v1439_v44 = vmax.f32 %v1203_v27, 0.0  ;;  %1893 = vmatpush.bf16.msrb.mxu0 %v2958_v12 }
 0x174   : > { %v1055_v30 = vpop.f32.mrf.mxu2 }
 0x175   : > { %v1056_v33 = vadd.f32 %v1055_v30, %v3707_v28  ;;  %v1104_v34 = vpop.f32.mrf.mxu3 }
 0x176   : > { %v1155_v35 = vpop.f32.mrf.mxu0 }
 0x177   : > { %v1105_v36 = vadd.f32 %v1104_v34, %v1056_v33  ;;  %v1156_v41 = vadd.f32 %v1155_v35, %v3701_v21  ;;  %v1204_v42 = vpop.f32.mrf.mxu1  ;;  %1894 = vmatpush.bf16.msrb.mxu0 %v2957_v14  ;;  %v2948_v33 = vld [vmem:[#allocation11 + $0x60] sm:$0xff] }
 0x178   : > { %1846 = vmatpush.bf16.msrb.mxu3 %v2948_v33 }
 0x179   : > { %v1205_v43 = vadd.f32 %v1204_v42, %v1156_v41  ;;  %v1438_v55 = vmax.f32 %v1105_v36, 0.0 }
 0x17b   : > { %v1443_v45 = vmax.f32 %v1205_v43, 0.0  ;;  %1895 = vmatpush.bf16.msrb.mxu0 %v2956_v46 }
 0x17c   : > { %v1057_v48 = vpop.f32.mrf.mxu2 }
 0x17d   : > { %v3713_v49 = vpack.c.bf16 %v1443_v45, %v1439_v44  ;;  %v1058_v13 = vadd.f32 %v1057_v48, %v3707_v28  ;;  %v1106_v50 = vpop.f32.mrf.mxu3  ;;  %v2964_v48 = vld [vmem:[#allocation11 + $0xe0] sm:$0xff] }
 0x17e   : > { %v1158_v51 = vpop.f32.mrf.mxu0  ;;  %1944 = vmatpush.bf16.msrb.mxu1 %v2964_v48 }
 0x17f   : > { %v1107_v52 = vadd.f32 %v1106_v50, %v1058_v13  ;;  %v1159_v53 = vadd.f32 %v1158_v51, %v3701_v21  ;;  %v1207_v54 = vpop.f32.mrf.mxu1  ;;  %v2939_v13 = vld [vmem:[#allocation11 + $0x18] sm:$0xff]  ;;  %1896 = vmatpush.bf16.msrb.mxu0 %v2955_v16  ;;  %v2944_v16 = vld [vmem:[#allocation11 + $0x40] sm:$0xff] }
 0x180   : > { %1798 = vmatpush.bf16.msrb.mxu2 %v2939_v13 }
 0x181   : > { %v1442_v56 = vmax.f32 %v1107_v52, 0.0  ;;  %v1208_v57 = vadd.f32 %v1207_v54, %v1159_v53  ;;  %1255 = vmatmul.bf16.gmra.mxu2 %v3618_v38  ;;  %1353 = vmatmul.bf16.gmra.mxu0 %v3618_v38 }
 0x182   : > { %1304 = vmatmul.bf16.gmra.mxu3 %v3620_v39  ;;  %1402 = vmatmul.bf16.gmra.mxu1 %v3620_v39 }
 0x183   : > { %v3721_v61 = vpack.c.bf16 %v1442_v56, %v1438_v55  ;;  %v1447_v38 = vmax.f32 %v1208_v57, 0.0 }
 0x184   : > { %v1060_v62 = vpop.f32.mrf.mxu2 }
 0x185   : > { %v1061_v1 = vadd.f32 %v1060_v62, %v3707_v28  ;;  %v1109_v2 = vpop.f32.mrf.mxu3 }
 0x186   : > { %v1160_v5 = vpop.f32.mrf.mxu0 }
 0x187   : > { %v1110_v7 = vadd.f32 %v1109_v2, %v1061_v1  ;;  %v1161_v9 = vadd.f32 %v1160_v5, %v3701_v21  ;;  %v1209_v10 = vpop.f32.mrf.mxu1  ;;  %v2947_v1 = vld [vmem:[#allocation11 + $0x58] sm:$0xff] }
 0x188   : > { %1847 = vmatpush.bf16.msrb.mxu3 %v2947_v1 }
 0x189   : > { %v1210_v11 = vadd.f32 %v1209_v10, %v1161_v9  ;;  %v1446_v27 = vmax.f32 %v1110_v7, 0.0 }
 0x18b   : > { %v1451_v15 = vmax.f32 %v1210_v11, 0.0 }
 0x18c   : > { %v1062_v39 = vpop.f32.mrf.mxu2 }
 0x18d   : > { %v1063_v58 = vadd.f32 %v1062_v39, %v3707_v28  ;;  %v1111_v20 = vpop.f32.mrf.mxu3  ;;  %v3726_v22 = vpack.c.bf16 %v1451_v15, %v1447_v38  ;;  %v2963_v39 = vld [vmem:[#allocation11 + $0xd8] sm:$0xff] }
 0x18e   : > { %v1163_v23 = vpop.f32.mrf.mxu0  ;;  %1945 = vmatpush.bf16.msrb.mxu1 %v2963_v39 }
 0x18f   : > { %v1112_v24 = vadd.f32 %v1111_v20, %v1063_v58  ;;  %v1164_v25 = vadd.f32 %v1163_v23, %v3701_v21  ;;  %v1212_v26 = vpop.f32.mrf.mxu1  ;;  %v2938_v58 = vld [vmem:[#allocation11 + $0x10] sm:$0xff] }
 0x190   : > { %1799 = vmatpush.bf16.msrb.mxu2 %v2938_v58 }
 0x191   : > { %v1450_v29 = vmax.f32 %v1112_v24, 0.0  ;;  %v1213_v30 = vadd.f32 %v1212_v26, %v1164_v25  ;;  %1260 = vmatmul.bf16.gmra.mxu2 %v3630_v6  ;;  %1358 = vmatmul.bf16.gmra.mxu0 %v3630_v6 }
 0x192   : > { %1309 = vmatmul.bf16.gmra.mxu3 %v3632_v8  ;;  %1407 = vmatmul.bf16.gmra.mxu1 %v3632_v8 }
 0x193   : > { %v3733_v34 = vpack.c.bf16 %v1450_v29, %v1446_v27  ;;  %v1455_v6 = vmax.f32 %v1213_v30, 0.0 }
 0x194   : > { %v1065_v35 = vpop.f32.mrf.mxu2 }
 0x195   : > { %v1066_v36 = vadd.f32 %v1065_v35, %v3707_v28  ;;  %v1114_v41 = vpop.f32.mrf.mxu3 }
 0x196   : > { %v1165_v42 = vpop.f32.mrf.mxu0 }
 0x197   : > { %v1115_v43 = vadd.f32 %v1114_v41, %v1066_v36  ;;  %v1166_v12 = vadd.f32 %v1165_v42, %v3701_v21  ;;  %v1214_v44 = vpop.f32.mrf.mxu1  ;;  %v2946_v36 = vld [vmem:[#allocation11 + $0x50] sm:$0xff] }
 0x198   : > { %1848 = vmatpush.bf16.msrb.mxu3 %v2946_v36 }
 0x199   : > { %v1215_v45 = vadd.f32 %v1214_v44, %v1166_v12  ;;  %v1454_v57 = vmax.f32 %v1115_v43, 0.0 }
 0x19b   : > { %v1459_v47 = vmax.f32 %v1215_v45, 0.0 }
 0x19c   : > { %v1067_v8 = vpop.f32.mrf.mxu2 }
 0x19d   : > { %v1068_v50 = vadd.f32 %v1067_v8, %v3707_v28  ;;  %v1116_v51 = vpop.f32.mrf.mxu3  ;;  %v3738_v52 = vpack.c.bf16 %v1459_v47, %v1455_v6  ;;  %v2954_v6 = vld [vmem:[#allocation11 + $0x90] sm:$0xff]  ;;  %v2937_v47 = vld [vmem:[#allocation11 + $0x8] sm:$0xff] }
 0x19e   : > { %v1168_v53 = vpop.f32.mrf.mxu0  ;;  %1897 = vmatpush.bf16.msrb.mxu0 %v2954_v6  ;;  %1800 = vmatpush.bf16.msrb.mxu2 %v2937_v47 }
 0x19f   : > { %v1117_v54 = vadd.f32 %v1116_v51, %v1068_v50  ;;  %v1169_v55 = vadd.f32 %v1168_v53, %v3701_v21  ;;  %v1217_v56 = vpop.f32.mrf.mxu1 }
 0x1a1   : > { %v1458_v60 = vmax.f32 %v1117_v54, 0.0  ;;  %v1218_v62 = vadd.f32 %v1217_v56, %v1169_v55  ;;  %1265 = vmatmul.bf16.gmra.mxu2 %v3642_v37  ;;  %1363 = vmatmul.bf16.gmra.mxu0 %v3642_v37 }
 0x1a2   : > { %1314 = vmatmul.bf16.gmra.mxu3 %v3644_v40  ;;  %1412 = vmatmul.bf16.gmra.mxu1 %v3644_v40 }
 0x1a3   : > { %v3745_v2 = vpack.c.bf16 %v1458_v60, %v1454_v57  ;;  %v1463_v37 = vmax.f32 %v1218_v62, 0.0  ;;  %v2945_v57 = vld [vmem:[#allocation11 + $0x48] sm:$0xff] }
 0x1a4   : > { %v1070_v5 = vpop.f32.mrf.mxu2  ;;  %1849 = vmatpush.bf16.msrb.mxu3 %v2945_v57 }
 0x1a5   : > { %v1071_v7 = vadd.f32 %v1070_v5, %v3707_v28  ;;  %v1119_v9 = vpop.f32.mrf.mxu3 }
 0x1a6   : > { %v1170_v10 = vpop.f32.mrf.mxu0 }
 0x1a7   : > { %v1120_v11 = vadd.f32 %v1119_v9, %v1071_v7  ;;  %v1171_v14 = vadd.f32 %v1170_v10, %v3701_v21  ;;  %v1219_v38 = vpop.f32.mrf.mxu1 }
 0x1a8   : > { %1850 = vmatpush.bf16.msrb.mxu3 %v2944_v16 }
 0x1a9   : > { %v1220_v15 = vadd.f32 %v1219_v38, %v1171_v14  ;;  %v1462_v30 = vmax.f32 %v1120_v11, 0.0  ;;  %v2953_v11 = vld [vmem:[#allocation11 + $0x88] sm:$0xff]  ;;  %v2936_v14 = vld [vmem:[#allocation11] sm:$0xff] }
 0x1aa   : > { %1898 = vmatpush.bf16.msrb.mxu0 %v2953_v11  ;;  %1801 = vmatpush.bf16.msrb.mxu2 %v2936_v14  ;;  %v3813_v11 = vperm.slane %v3698_v59, 3 }
 0x1ab   : > { %v1467_v17 = vmax.f32 %v1220_v15, 0.0 }
 0x1ac   : > { %v1072_v40 = vpop.f32.mrf.mxu2 }
 0x1ad   : > { %v1073_v20 = vadd.f32 %v1072_v40, %v3707_v28  ;;  %v1121_v23 = vpop.f32.mrf.mxu3  ;;  %v3750_v24 = vpack.c.bf16 %v1467_v17, %v1463_v37 }
 0x1ae   : > { %v1173_v25 = vpop.f32.mrf.mxu0 }
 0x1af   : > { %v1122_v26 = vadd.f32 %v1121_v23, %v1073_v20  ;;  %v1174_v27 = vadd.f32 %v1173_v25, %v3701_v21  ;;  %v1222_v29 = vpop.f32.mrf.mxu1 }
 0x1b1   : > { %v1466_v33 = vmax.f32 %v1122_v26, 0.0  ;;  %v3753_v35 = vadd.f32 %v1222_v29, %v1174_v27  ;;  %1270 = vmatmul.bf16.gmra.mxu2 %v3654_v3  ;;  %1368 = vmatmul.bf16.gmra.mxu0 %v3654_v3  ;;  %v2962_v3 = vld [vmem:[#allocation11 + $0xd0] sm:$0xff] }
 0x1b2   : > { %1319 = vmatmul.bf16.gmra.mxu3 %v3656_v4  ;;  %1417 = vmatmul.bf16.gmra.mxu1 %v3656_v4 }
 0x1b3   : > { %v3759_v41 = vpack.c.bf16 %v1466_v33, %v1462_v30  ;;  %1946 = vmatpush.bf16.msrb.mxu1 %v2962_v3 }
 0x1b4   : > { %v1075_v42 = vpop.f32.mrf.mxu2 }
 0x1b5   : > { %v1076_v43 = vadd.f32 %v1075_v42, %v3707_v28  ;;  %v1124_v12 = vpop.f32.mrf.mxu3  ;;  %v2952_v42 = vld [vmem:[#allocation11 + $0x80] sm:$0xff] }
 0x1b6   : > { %v3762_v44 = vpop.f32.mrf.mxu0  ;;  %1899 = vmatpush.bf16.msrb.mxu0 %v2952_v42 }
 0x1b7   : > { %v1125_v45 = vadd.f32 %v1124_v12, %v1076_v43  ;;  %v3764_v46 = vpop.f32.mrf.mxu1  ;;  %v2960_v43 = vld [vmem:[#allocation11 + $0xc0] sm:$0xff] }
 0x1b9   : > { %v1470_v54 = vmax.f32 %v1125_v45, 0.0 }
 0x1bc   : > { %v1077_v48 = vpop.f32.mrf.mxu2 }
 0x1bd   : > { %v1078_v13 = vadd.f32 %v1077_v48, %v3707_v28  ;;  %v1126_v4 = vpop.f32.mrf.mxu3 }
 0x1be   : > { %v1178_v8 = vpop.f32.mrf.mxu0 }
 0x1bf   : > { %v1127_v50 = vadd.f32 %v1126_v4, %v1078_v13  ;;  %v1179_v51 = vadd.f32 %v1178_v8, %v3701_v21  ;;  %v1227_v53 = vpop.f32.mrf.mxu1 }
 0x1c1   : > { %v1474_v55 = vmax.f32 %v1127_v50, 0.0  ;;  %v3768_v56 = vadd.f32 %v1227_v53, %v1179_v51  ;;  %1275 = vmatmul.bf16.gmra.mxu2 %v3666_v31  ;;  %1373 = vmatmul.bf16.gmra.mxu0 %v3666_v31  ;;  %v2961_v31 = vld [vmem:[#allocation11 + $0xc8] sm:$0xff] }
 0x1c2   : > { %1324 = vmatmul.bf16.gmra.mxu3 %v3668_v32  ;;  %1422 = vmatmul.bf16.gmra.mxu1 %v3668_v32 }
 0x1c3   : > { %v3774_v60 = vpack.c.bf16 %v1474_v55, %v1470_v54  ;;  %1947 = vmatpush.bf16.msrb.mxu1 %v2961_v31 }
 0x1c4   : > { %v1080_v62 = vpop.f32.mrf.mxu2 }
 0x1c5   : > { %v1081_v1 = vadd.f32 %v1080_v62, %v3707_v28  ;;  %v1129_v5 = vpop.f32.mrf.mxu3 }
 0x1c6   : > { %v3777_v7 = vpop.f32.mrf.mxu0 }
 0x1c7   : > { %v1130_v9 = vadd.f32 %v1129_v5, %v1081_v1  ;;  %v3779_v10 = vpop.f32.mrf.mxu1  ;;  %1948 = vmatpush.bf16.msrb.mxu1 %v2960_v43 }
 0x1c9   : > { %v1478_v40 = vmax.f32 %v1130_v9, 0.0 }
 0x1cc   : > { %v1082_v38 = vpop.f32.mrf.mxu2 }
 0x1cd   : > { %v1083_v15 = vadd.f32 %v1082_v38, %v3707_v28  ;;  %v1131_v32 = vpop.f32.mrf.mxu3 }
 0x1ce   : > { %v1183_v37 = vpop.f32.mrf.mxu0 }
 0x1cf   : > { %v1132_v17 = vadd.f32 %v1131_v32, %v1083_v15  ;;  %v1184_v39 = vadd.f32 %v1183_v37, %v3701_v21  ;;  %v1232_v58 = vpop.f32.mrf.mxu1 }
 0x1d1   : > { %v1482_v20 = vmax.f32 %v1132_v17, 0.0  ;;  %v3783_v23 = vadd.f32 %v1232_v58, %v1184_v39  ;;  %1280 = vmatmul.bf16.gmra.mxu2 %v3678_v63  ;;  %1378 = vmatmul.bf16.gmra.mxu0 %v3678_v63 }
 0x1d2   : > { %1329 = vmatmul.bf16.gmra.mxu3 %v3680_v0  ;;  %1427 = vmatmul.bf16.gmra.mxu1 %v3680_v0 }
 0x1d3   : > { %v3789_v25 = vpack.c.bf16 %v1482_v20, %v1478_v40 }
 0x1d4   : > { %v1085_v26 = vpop.f32.mrf.mxu2 }
 0x1d5   : > { %v1086_v27 = vadd.f32 %v1085_v26, %v3707_v28  ;;  %v1134_v29 = vpop.f32.mrf.mxu3 }
 0x1d6   : > { %v3792_v30 = vpop.f32.mrf.mxu0 }
 0x1d7   : > { %v1135_v33 = vadd.f32 %v1134_v29, %v1086_v27  ;;  %v3794_v36 = vpop.f32.mrf.mxu1 }
 0x1d9   : > { %v1486_v48 = vmax.f32 %v1135_v33, 0.0 }
 0x1dc   : > { %v1087_v12 = vpop.f32.mrf.mxu2 }
 0x1dd   : > { %v1088_v63 = vadd.f32 %v1087_v12, %v3707_v28  ;;  %v1136_v45 = vpop.f32.mrf.mxu3 }
 0x1de   : > { %v1188_v0 = vpop.f32.mrf.mxu0 }
 0x1df   : > { %v1137_v6 = vadd.f32 %v1136_v45, %v1088_v63  ;;  %v1189_v3 = vadd.f32 %v1188_v0, %v3701_v21  ;;  %v1237_v47 = vpop.f32.mrf.mxu1 }
 0x1e1   : > { %v1490_v13 = vmax.f32 %v1137_v6, 0.0  ;;  %v3798_v4 = vadd.f32 %v1237_v47, %v1189_v3  ;;  %1285 = vmatmul.bf16.gmra.mxu2 %v3690_v18  ;;  %1383 = vmatmul.bf16.gmra.mxu0 %v3690_v18 }
 0x1e2   : > { %1334 = vmatmul.bf16.gmra.mxu3 %v3692_v19  ;;  %1432 = vmatmul.bf16.gmra.mxu1 %v3692_v19 }
 0x1e3   : > { %v3804_v8 = vpack.c.bf16 %v1490_v13, %v1486_v48 }
 0x1e4   : > { %v1090_v50 = vpop.f32.mrf.mxu2 }
 0x1e5   : > { %v1091_v51 = vadd.f32 %v1090_v50, %v3707_v28  ;;  %v1139_v53 = vpop.f32.mrf.mxu3 }
 0x1e6   : > { %v3807_v54 = vpop.f32.mrf.mxu0 }
 0x1e7   : > { %v1140_v55 = vadd.f32 %v1139_v53, %v1091_v51  ;;  %v3809_v57 = vpop.f32.mrf.mxu1 }
 0x1e9   : > { %v1494_v31 = vmax.f32 %v1140_v55, 0.0 }
 0x1ec   : > { %v1092_v62 = vpop.f32.mrf.mxu2 }
 0x1ed   : > { %v1093_v1 = vadd.f32 %v1092_v62, %v3707_v28  ;;  %v1141_v5 = vpop.f32.mrf.mxu3  ;;  %v3821_v28 = vperm.slane %v3698_v59, 2 }
 0x1ee   : > { %v1349_v18 = vpop.f32.mrf.mxu0 }
 0x1ef   : > { %v1142_v9 = vadd.f32 %v1141_v5, %v1093_v1  ;;  %v1398_v19 = vpop.f32.mrf.mxu1  ;;  %v1350_v38 = vadd.f32 %v1349_v18, %v3813_v11 }
 0x1f1   : > { %v1498_v14 = vmax.f32 %v1142_v9, 0.0  ;;  %1802 = vmatmul.bf16.vlgmr.msrb.gmra.mxu2 %v3721_v61  ;;  %v1399_v17 = vadd.f32 %v1398_v19, %v1350_v38 }
 0x1f2   : > { %1851 = vmatmul.bf16.vlgmr.msrb.gmra.mxu3 %v3713_v49 }
 0x1f3   : > { %v3818_v15 = vpack.c.bf16 %v1498_v14, %v1494_v31  ;;  %v1441_v61 = vmax.f32 %v1399_v17, 0.0 }
 0x1f4   : > { %v1251_v32 = vpop.f32.mrf.mxu2 }
 0x1f5   : > { %v1300_v16 = vpop.f32.mrf.mxu3  ;;  %v1252_v40 = vadd.f32 %v1251_v32, %v3821_v28 }
 0x1f6   : > { %v1351_v37 = vpop.f32.mrf.mxu0 }
 0x1f7   : > { %v1352_v39 = vadd.f32 %v1351_v37, %v3813_v11  ;;  %v1400_v58 = vpop.f32.mrf.mxu1  ;;  %v1301_v27 = vadd.f32 %v1300_v16, %v1252_v40 }
 0x1f9   : > { %v1401_v20 = vadd.f32 %v1400_v58, %v1352_v39  ;;  %v1440_v63 = vmax.f32 %v1301_v27, 0.0 }
 0x1fb   : > { %v1445_v26 = vmax.f32 %v1401_v20, 0.0 }
 0x1fc   : > { %v1253_v49 = vpop.f32.mrf.mxu2 }
 0x1fd   : > { %v1505_v29 = vpack.c.bf16 %v1445_v26, %v1441_v61  ;;  %v1254_v33 = vadd.f32 %v1253_v49, %v3821_v28  ;;  %v1302_v42 = vpop.f32.mrf.mxu3 }
 0x1fe   : > { %v1354_v43 = vpop.f32.mrf.mxu0 }
 0x1ff   : > { %v1303_v59 = vadd.f32 %v1302_v42, %v1254_v33  ;;  %v1403_v12 = vpop.f32.mrf.mxu1  ;;  %1949 = vmatmul.bf16.vlgmr.msrb.gmra.mxu1 %v1505_v29  ;;  %v1355_v6 = vadd.f32 %v1354_v43, %v3813_v11 }
 0x201   : > { %v1444_v45 = vmax.f32 %v1303_v59, 0.0  ;;  %1807 = vmatmul.bf16.gmra.mxu2 %v3733_v34  ;;  %v1404_v13 = vadd.f32 %v1403_v12, %v1355_v6 }
 0x202   : > { %1856 = vmatmul.bf16.gmra.mxu3 %v3726_v22 }
 0x203   : > { %v1504_v0 = vpack.c.bf16 %v1444_v45, %v1440_v63  ;;  %v1449_v62 = vmax.f32 %v1404_v13, 0.0 }
 0x204   : > { %v1256_v3 = vpop.f32.mrf.mxu2 }
 0x205   : > { %v1305_v47 = vpop.f32.mrf.mxu3  ;;  %1900 = vmatmul.bf16.vlgmr.msrb.gmra.mxu0 %v1504_v0  ;;  %v1257_v53 = vadd.f32 %v1256_v3, %v3821_v28 }
 0x206   : > { %v1356_v48 = vpop.f32.mrf.mxu0 }
 0x207   : > { %v1357_v50 = vadd.f32 %v1356_v48, %v3813_v11  ;;  %v1405_v51 = vpop.f32.mrf.mxu1  ;;  %v1306_v34 = vadd.f32 %v1305_v47, %v1257_v53  ;;  %v1176_v47 = vadd.f32 %v3762_v44, %v3701_v21 }
 0x209   : > { %v1406_v55 = vadd.f32 %v1405_v51, %v1357_v50  ;;  %v1448_v38 = vmax.f32 %v1306_v34, 0.0 }
 0x20b   : > { %v1453_v1 = vmax.f32 %v1406_v55, 0.0 }
 0x20c   : > { %v1258_v5 = vpop.f32.mrf.mxu2 }
 0x20d   : > { %v1259_v22 = vadd.f32 %v1258_v5, %v3821_v28  ;;  %v1307_v18 = vpop.f32.mrf.mxu3  ;;  %v1509_v9 = vpack.c.bf16 %v1453_v1, %v1449_v62  ;;  %v1225_v62 = vadd.f32 %v3764_v46, %v1176_v47 }
 0x20e   : > { %v1359_v19 = vpop.f32.mrf.mxu0 }
 0x20f   : > { %v1308_v31 = vadd.f32 %v1307_v18, %v1259_v22  ;;  %v1408_v14 = vpop.f32.mrf.mxu1  ;;  %1954 = vmatmul.bf16.gmra.mxu1 %v1509_v9  ;;  %v1360_v16 = vadd.f32 %v1359_v19, %v3813_v11  ;;  %v1475_v34 = vmax.f32 %v1225_v62, 0.0 }
 0x211   : > { %v1452_v32 = vmax.f32 %v1308_v31, 0.0  ;;  %1812 = vmatmul.bf16.gmra.mxu2 %v3745_v2  ;;  %v1409_v40 = vadd.f32 %v1408_v14, %v1360_v16  ;;  %v1471_v31 = vmax.f32 %v3753_v35, 0.0 }
 0x212   : > { %1861 = vmatmul.bf16.gmra.mxu3 %v3738_v52 }
 0x213   : > { %v1508_v37 = vpack.c.bf16 %v1452_v32, %v1448_v38  ;;  %v1457_v27 = vmax.f32 %v1409_v40, 0.0  ;;  %v1519_v16 = vpack.c.bf16 %v1475_v34, %v1471_v31  ;;  %v1487_v31 = vmax.f32 %v3783_v23, 0.0 }
 0x214   : > { %v1261_v17 = vpop.f32.mrf.mxu2 }
 0x215   : > { %v1310_v39 = vpop.f32.mrf.mxu3  ;;  %1905 = vmatmul.bf16.gmra.mxu0 %v1508_v37  ;;  %v1262_v26 = vadd.f32 %v1261_v17, %v3821_v28 }
 0x216   : > { %v1361_v58 = vpop.f32.mrf.mxu0 }
 0x217   : > { %v1362_v20 = vadd.f32 %v1361_v58, %v3813_v11  ;;  %v1410_v61 = vpop.f32.mrf.mxu1  ;;  %v1311_v2 = vadd.f32 %v1310_v39, %v1262_v26  ;;  %v1181_v58 = vadd.f32 %v3777_v7, %v3701_v21 }
 0x219   : > { %v1411_v49 = vadd.f32 %v1410_v61, %v1362_v20  ;;  %v1456_v45 = vmax.f32 %v1311_v2, 0.0 }
 0x21b   : > { %v1461_v29 = vmax.f32 %v1411_v49, 0.0 }
 0x21c   : > { %v1263_v33 = vpop.f32.mrf.mxu2 }
 0x21d   : > { %v1264_v52 = vadd.f32 %v1263_v33, %v3821_v28  ;;  %v1312_v42 = vpop.f32.mrf.mxu3  ;;  %v1513_v43 = vpack.c.bf16 %v1461_v29, %v1457_v27  ;;  %v1230_v27 = vadd.f32 %v3779_v10, %v1181_v58 }
 0x21e   : > { %v1364_v59 = vpop.f32.mrf.mxu0 }
 0x21f   : > { %v1313_v12 = vadd.f32 %v1312_v42, %v1264_v52  ;;  %v1413_v63 = vpop.f32.mrf.mxu1  ;;  %1959 = vmatmul.bf16.gmra.mxu1 %v1513_v43  ;;  %v1365_v6 = vadd.f32 %v1364_v59, %v3813_v11  ;;  %v1483_v52 = vmax.f32 %v1230_v27, 0.0 }
 0x221   : > { %v1460_v0 = vmax.f32 %v1313_v12, 0.0  ;;  %1817 = vmatmul.bf16.gmra.mxu2 %v3759_v41  ;;  %v1414_v51 = vadd.f32 %v1413_v63, %v1365_v6  ;;  %v1479_v63 = vmax.f32 %v3768_v56, 0.0 }
 0x222   : > { %1866 = vmatmul.bf16.gmra.mxu3 %v3750_v24 }
 0x223   : > { %v1512_v3 = vpack.c.bf16 %v1460_v0, %v1456_v45  ;;  %v1465_v24 = vmax.f32 %v1414_v51, 0.0 }
 0x224   : > { %v1266_v48 = vpop.f32.mrf.mxu2 }
 0x225   : > { %v1315_v13 = vpop.f32.mrf.mxu3  ;;  %1910 = vmatmul.bf16.gmra.mxu0 %v1512_v3  ;;  %v1267_v41 = vadd.f32 %v1266_v48, %v3821_v28  ;;  %v1523_v3 = vpack.c.bf16 %v1483_v52, %v1479_v63 }
 0x226   : > { %v1366_v50 = vpop.f32.mrf.mxu0 }
 0x227   : > { %v1367_v53 = vadd.f32 %v1366_v50, %v3813_v11  ;;  %v1415_v55 = vpop.f32.mrf.mxu1  ;;  %v1316_v18 = vadd.f32 %v1315_v13, %v1267_v41  ;;  %v1186_v50 = vadd.f32 %v3792_v30, %v3701_v21 }
 0x229   : > { %v1416_v1 = vadd.f32 %v1415_v55, %v1367_v53  ;;  %v1464_v46 = vmax.f32 %v1316_v18, 0.0 }
 0x22b   : > { %v1469_v5 = vmax.f32 %v1416_v1, 0.0  ;;  %v1235_v1 = vadd.f32 %v3794_v36, %v1186_v50 }
 0x22c   : > { %v1268_v22 = vpop.f32.mrf.mxu2 }
 0x22d   : > { %v1269_v44 = vadd.f32 %v1268_v22, %v3821_v28  ;;  %v1317_v9 = vpop.f32.mrf.mxu3  ;;  %v1517_v19 = vpack.c.bf16 %v1469_v5, %v1465_v24  ;;  %v1491_v22 = vmax.f32 %v1235_v1, 0.0 }
 0x22e   : > { %v1369_v14 = vpop.f32.mrf.mxu0 }
 0x22f   : > { %v1318_v38 = vadd.f32 %v1317_v9, %v1269_v44  ;;  %v1418_v32 = vpop.f32.mrf.mxu1  ;;  %1964 = vmatmul.bf16.gmra.mxu1 %v1517_v19  ;;  %v1370_v17 = vadd.f32 %v1369_v14, %v3813_v11 }
 0x231   : > { %v1468_v37 = vmax.f32 %v1318_v38, 0.0  ;;  %1822 = vmatmul.bf16.gmra.mxu2 %v3774_v60  ;;  %v1419_v61 = vadd.f32 %v1418_v32, %v1370_v17 }
 0x232   : > { %1871 = vmatmul.bf16.gmra.mxu3 %v1519_v16  ;;  %v1527_v16 = vpack.c.bf16 %v1491_v22, %v1487_v31 }
 0x233   : > { %v1516_v39 = vpack.c.bf16 %v1468_v37, %v1464_v46  ;;  %v1473_v33 = vmax.f32 %v1419_v61, 0.0 }
 0x234   : > { %v1271_v40 = vpop.f32.mrf.mxu2 }
 0x235   : > { %v1320_v20 = vpop.f32.mrf.mxu3  ;;  %1915 = vmatmul.bf16.gmra.mxu0 %v1516_v39  ;;  %v1272_v29 = vadd.f32 %v1271_v40, %v3821_v28  ;;  %v1191_v39 = vadd.f32 %v3807_v54, %v3701_v21 }
 0x236   : > { %v1371_v35 = vpop.f32.mrf.mxu0 }
 0x237   : > { %v1372_v26 = vadd.f32 %v1371_v35, %v3813_v11  ;;  %v1420_v49 = vpop.f32.mrf.mxu1  ;;  %v1321_v43 = vadd.f32 %v1320_v20, %v1272_v29 }
 0x239   : > { %v1421_v60 = vadd.f32 %v1420_v49, %v1372_v26  ;;  %v1472_v10 = vmax.f32 %v1321_v43, 0.0  ;;  %v1240_v26 = vadd.f32 %v3809_v57, %v1191_v39 }
 0x23b   : > { %v1477_v2 = vmax.f32 %v1421_v60, 0.0  ;;  %v1499_v60 = vmax.f32 %v1240_v26, 0.0 }
 0x23c   : > { %v1273_v42 = vpop.f32.mrf.mxu2 }
 0x23d   : > { %v1521_v59 = vpack.c.bf16 %v1477_v2, %v1473_v33  ;;  %v1274_v7 = vadd.f32 %v1273_v42, %v3821_v28  ;;  %v1322_v12 = vpop.f32.mrf.mxu3  ;;  %v1495_v42 = vmax.f32 %v3798_v4, 0.0 }
 0x23e   : > { %v1374_v45 = vpop.f32.mrf.mxu0 }
 0x23f   : > { %v1323_v0 = vadd.f32 %v1322_v12, %v1274_v7  ;;  %v1423_v6 = vpop.f32.mrf.mxu1  ;;  %1969 = vmatmul.bf16.gmra.mxu1 %v1521_v59  ;;  %v1375_v13 = vadd.f32 %v1374_v45, %v3813_v11  ;;  %v1531_v12 = vpack.c.bf16 %v1499_v60, %v1495_v42 }
 0x241   : > { %v1476_v47 = vmax.f32 %v1323_v0, 0.0  ;;  %1827 = vmatmul.bf16.gmra.mxu2 %v3789_v25  ;;  %v1424_v55 = vadd.f32 %v1423_v6, %v1375_v13 }
 0x242   : > { %1876 = vmatmul.bf16.gmra.mxu3 %v1523_v3 }
 0x243   : > { %v1520_v48 = vpack.c.bf16 %v1476_v47, %v1472_v10  ;;  %v1481_v5 = vmax.f32 %v1424_v55, 0.0 }
 0x244   : > { %v1276_v51 = vpop.f32.mrf.mxu2 }
 0x245   : > { %v1325_v53 = vpop.f32.mrf.mxu3  ;;  %1920 = vmatmul.bf16.gmra.mxu0 %v1520_v48  ;;  %v1277_v24 = vadd.f32 %v1276_v51, %v3821_v28 }
 0x246   : > { %v1376_v56 = vpop.f32.mrf.mxu0 }
 0x247   : > { %v1377_v62 = vadd.f32 %v1376_v56, %v3813_v11  ;;  %v1425_v41 = vpop.f32.mrf.mxu1  ;;  %v1326_v44 = vadd.f32 %v1325_v53, %v1277_v24 }
 0x249   : > { %v1426_v25 = vadd.f32 %v1425_v41, %v1377_v62  ;;  %v1480_v36 = vmax.f32 %v1326_v44, 0.0 }
 0x24b   : > { %v1485_v34 = vmax.f32 %v1426_v25, 0.0 }
 0x24c   : > { %v1278_v18 = vpop.f32.mrf.mxu2 }
 0x24d   : > { %v1525_v9 = vpack.c.bf16 %v1485_v34, %v1481_v5  ;;  %v1279_v30 = vadd.f32 %v1278_v18, %v3821_v28  ;;  %v1327_v19 = vpop.f32.mrf.mxu3 }
 0x24e   : > { %v1379_v14 = vpop.f32.mrf.mxu0 }
 0x24f   : > { %v1328_v38 = vadd.f32 %v1327_v19, %v1279_v30  ;;  %v1428_v32 = vpop.f32.mrf.mxu1  ;;  %1974 = vmatmul.bf16.gmra.mxu1 %v1525_v9  ;;  %v1380_v17 = vadd.f32 %v1379_v14, %v3813_v11 }
 0x251   : > { %v1484_v46 = vmax.f32 %v1328_v38, 0.0  ;;  %1832 = vmatmul.bf16.gmra.mxu2 %v3804_v8  ;;  %v1429_v20 = vadd.f32 %v1428_v32, %v1380_v17 }
 0x252   : > { %1881 = vmatmul.bf16.gmra.mxu3 %v1527_v16 }
 0x253   : > { %v1524_v37 = vpack.c.bf16 %v1484_v46, %v1480_v36  ;;  %v1489_v27 = vmax.f32 %v1429_v20, 0.0 }
 0x254   : > { %v1281_v58 = vpop.f32.mrf.mxu2 }
 0x255   : > { %v1330_v40 = vpop.f32.mrf.mxu3  ;;  %1925 = vmatmul.bf16.gmra.mxu0 %v1524_v37  ;;  %v1282_v49 = vadd.f32 %v1281_v58, %v3821_v28 }
 0x256   : > { %v1381_v23 = vpop.f32.mrf.mxu0 }
 0x257   : > { %v1382_v35 = vadd.f32 %v1381_v23, %v3813_v11  ;;  %v1430_v61 = vpop.f32.mrf.mxu1  ;;  %v1331_v2 = vadd.f32 %v1330_v40, %v1282_v49 }
 0x259   : > { %v1431_v8 = vadd.f32 %v1430_v61, %v1382_v35  ;;  %v1488_v57 = vmax.f32 %v1331_v2, 0.0 }
 0x25b   : > { %v1493_v29 = vmax.f32 %v1431_v8, 0.0 }
 0x25c   : > { %v1283_v33 = vpop.f32.mrf.mxu2 }
 0x25d   : > { %v1529_v52 = vpack.c.bf16 %v1493_v29, %v1489_v27  ;;  %v1284_v21 = vadd.f32 %v1283_v33, %v3821_v28  ;;  %v1332_v54 = vpop.f32.mrf.mxu3 }
 0x25e   : > { %v1384_v43 = vpop.f32.mrf.mxu0 }
 0x25f   : > { %v1333_v59 = vadd.f32 %v1332_v54, %v1284_v21  ;;  %v1433_v7 = vpop.f32.mrf.mxu1  ;;  %1979 = vmatmul.bf16.gmra.mxu1 %v1529_v52  ;;  %v1385_v0 = vadd.f32 %v1384_v43, %v3813_v11 }
 0x261   : > { %v1492_v63 = vmax.f32 %v1333_v59, 0.0  ;;  %1837 = vmatmul.bf16.gmra.mxu2 %v3818_v15  ;;  %v1434_v47 = vadd.f32 %v1433_v7, %v1385_v0 }
 0x262   : > { %1886 = vmatmul.bf16.gmra.mxu3 %v1531_v12 }
 0x263   : > { %v1528_v45 = vpack.c.bf16 %v1492_v63, %v1488_v57  ;;  %v1497_v51 = vmax.f32 %v1434_v47, 0.0 }
 0x264   : > { %v1286_v6 = vpop.f32.mrf.mxu2 }
 0x265   : > { %v1335_v3 = vpop.f32.mrf.mxu3  ;;  %1930 = vmatmul.bf16.gmra.mxu0 %v1528_v45  ;;  %v1287_v13 = vadd.f32 %v1286_v6, %v3821_v28 }
 0x266   : > { %v1386_v10 = vpop.f32.mrf.mxu0 }
 0x267   : > { %v1387_v4 = vadd.f32 %v1386_v10, %v3813_v11  ;;  %v1435_v48 = vpop.f32.mrf.mxu1  ;;  %v1336_v55 = vadd.f32 %v1335_v3, %v1287_v13  ;;  %v3883_v11 = vld [vmem:[%s4040_s6] ss:$0 sm:$0xff] }
 0x269   : > { %v1436_v50 = vadd.f32 %v1435_v48, %v1387_v4  ;;  %v1496_v24 = vmax.f32 %v1336_v55, 0.0 }
 0x26b   : > { %v1501_v53 = vmax.f32 %v1436_v50, 0.0 }
 0x26c   : > { %v1288_v56 = vpop.f32.mrf.mxu2 }
 0x26d   : > { %v1533_v15 = vpack.c.bf16 %v1501_v53, %v1497_v51  ;;  %v1289_v62 = vadd.f32 %v1288_v56, %v3821_v28  ;;  %v1337_v41 = vpop.f32.mrf.mxu3 }
 0x26f   : > { %v1338_v1 = vadd.f32 %v1337_v41, %v1289_v62  ;;  %1984 = vmatmul.bf16.gmra.mxu1 %v1533_v15 }
 0x271   : > { %v1500_v25 = vmax.f32 %v1338_v1, 0.0 }
 0x273   : > { %v1532_v5 = vpack.c.bf16 %v1500_v25, %v1496_v24 }
 0x274   : > { %v1803_v34 = vpop.f32.mrf.mxu2 }
 0x275   : > { %v1852_v22 = vpop.f32.mrf.mxu3  ;;  %1935 = vmatmul.bf16.gmra.mxu0 %v1532_v5  ;;  %v1804_v9 = vadd.f32 %v3883_v11, %v1803_v34 }
 0x277   : > { %v1853_v28 = vadd.f32 %v1852_v22, %v1804_v9 }
 0x27c   : > { %v1805_v18 = vpop.f32.mrf.mxu2  ;;  %v1950_v44 = vpop.f32.mrf.mxu1 }
 0x27d   : > { %v1854_v30 = vpop.f32.mrf.mxu3  ;;  %v1806_v32 = vadd.f32 %v3883_v11, %v1805_v18 }
 0x27f   : > { %v1855_v37 = vadd.f32 %v1854_v30, %v1806_v32 }
 0x282   : > { %v1901_v19 = vpop.f32.mrf.mxu0 }
 0x283   : > { %v1902_v31 = vadd.f32 %v1901_v19, %v1853_v28 }
 0x284   : > { %v1808_v14 = vpop.f32.mrf.mxu2  ;;  %v1952_v38 = vpop.f32.mrf.mxu1 }
 0x285   : > { %v1857_v16 = vpop.f32.mrf.mxu3  ;;  %v3887_v36 = vadd.f32 %v1950_v44, %v1902_v31  ;;  %v1809_v23 = vadd.f32 %v3883_v11, %v1808_v14 }
 0x287   : > { %v1990_v46 = vmul.f32 %v3887_v36, %v3887_v36  ;;  %v1858_v26 = vadd.f32 %v1857_v16, %v1809_v23 }
 0x289   : > { %2006 = vadd.xlane.f32.xlu0 %v1990_v46 }
 0x28a   : > { %v1903_v17 = vpop.f32.mrf.mxu0 }
 0x28b   : > { %v1904_v39 = vadd.f32 %v1903_v17, %v1855_v37 }
 0x28c   : > { %v1810_v58 = vpop.f32.mrf.mxu2  ;;  %v1955_v40 = vpop.f32.mrf.mxu1 }
 0x28d   : > { %v3892_v20 = vadd.f32 %v1952_v38, %v1904_v39  ;;  %v1859_v35 = vpop.f32.mrf.mxu3  ;;  %v1811_v60 = vadd.f32 %v3883_v11, %v1810_v58 }
 0x28f   : > { %v1991_v61 = vmul.f32 %v3892_v20, %v3892_v20  ;;  %v1860_v21 = vadd.f32 %v1859_v35, %v1811_v60 }
 0x291   : > { %2008 = vadd.xlane.f32.xlu0 %v1991_v61 }
 0x292   : > { %v1906_v49 = vpop.f32.mrf.mxu0 }
 0x293   : > { %v1907_v8 = vadd.f32 %v1906_v49, %v1858_v26 }
 0x294   : > { %v1813_v27 = vpop.f32.mrf.mxu2  ;;  %v1957_v29 = vpop.f32.mrf.mxu1 }
 0x295   : > { %v1862_v33 = vpop.f32.mrf.mxu3  ;;  %v3897_v2 = vadd.f32 %v1955_v40, %v1907_v8  ;;  %v1814_v7 = vadd.f32 %v3883_v11, %v1813_v27 }
 0x297   : > { %v1992_v52 = vmul.f32 %v3897_v2, %v3897_v2  ;;  %v1863_v45 = vadd.f32 %v1862_v33, %v1814_v7 }
 0x299   : > { %2010 = vadd.xlane.f32.xlu1 %v1992_v52 }
 0x29a   : > { %v1908_v54 = vpop.f32.mrf.mxu0 }
 0x29b   : > { %v1909_v42 = vadd.f32 %v1908_v54, %v1860_v21 }
 0x29c   : > { %v1815_v43 = vpop.f32.mrf.mxu2  ;;  %v1960_v59 = vpop.f32.mrf.mxu1 }
 0x29d   : > { %v3902_v12 = vadd.f32 %v1957_v29, %v1909_v42  ;;  %v1864_v57 = vpop.f32.mrf.mxu3  ;;  %v1816_v47 = vadd.f32 %v3883_v11, %v1815_v43 }
 0x29f   : > { %v1993_v63 = vmul.f32 %v3902_v12, %v3902_v12  ;;  %v1865_v50 = vadd.f32 %v1864_v57, %v1816_v47 }
 0x2a1   : > { %2012 = vadd.xlane.f32.xlu1 %v1993_v63 }
 0x2a2   : > { %v1911_v0 = vpop.f32.mrf.mxu0 }
 0x2a3   : > { %v1912_v6 = vadd.f32 %v1911_v0, %v1863_v45 }
 0x2a4   : > { %v1818_v3 = vpop.f32.mrf.mxu2  ;;  %v1962_v10 = vpop.f32.mrf.mxu1 }
 0x2a5   : > { %v1867_v4 = vpop.f32.mrf.mxu3  ;;  %v3907_v48 = vadd.f32 %v1960_v59, %v1912_v6  ;;  %v1819_v15 = vadd.f32 %v3883_v11, %v1818_v3 }
 0x2a7   : > { %v1994_v13 = vmul.f32 %v3907_v48, %v3907_v48  ;;  %v1868_v24 = vadd.f32 %v1867_v4, %v1819_v15 }
 0x2a9   : > { %2014 = vadd.xlane.f32.xlu2 %v1994_v13 }
 0x2aa   : > { %v1913_v51 = vpop.f32.mrf.mxu0 }
 0x2ab   : > { %v1914_v53 = vadd.f32 %v1913_v51, %v1865_v50 }
 0x2ac   : > { %v1820_v56 = vpop.f32.mrf.mxu2  ;;  %v1965_v55 = vpop.f32.mrf.mxu1 }
 0x2ad   : > { %v3912_v62 = vadd.f32 %v1962_v10, %v1914_v53  ;;  %v1869_v41 = vpop.f32.mrf.mxu3  ;;  %v1821_v18 = vadd.f32 %v3883_v11, %v1820_v56 }
 0x2af   : > { %v1995_v1 = vmul.f32 %v3912_v62, %v3912_v62  ;;  %v1870_v28 = vadd.f32 %v1869_v41, %v1821_v18 }
 0x2b1   : > { %2016 = vadd.xlane.f32.xlu2 %v1995_v1 }
 0x2b2   : > { %v1916_v25 = vpop.f32.mrf.mxu0 }
 0x2b3   : > { %v1917_v5 = vadd.f32 %v1916_v25, %v1868_v24 }
 0x2b4   : > { %v1823_v34 = vpop.f32.mrf.mxu2  ;;  %v1967_v22 = vpop.f32.mrf.mxu1 }
 0x2b5   : > { %v3917_v44 = vadd.f32 %v1965_v55, %v1917_v5  ;;  %v1872_v9 = vpop.f32.mrf.mxu3  ;;  %v1824_v32 = vadd.f32 %v3883_v11, %v1823_v34 }
 0x2b7   : > { %v1996_v30 = vmul.f32 %v3917_v44, %v3917_v44  ;;  %v1873_v17 = vadd.f32 %v1872_v9, %v1824_v32 }
 0x2b9   : > { %2018 = vadd.xlane.f32.xlu0 %v1996_v30 }
 0x2ba   : > { %v1918_v19 = vpop.f32.mrf.mxu0 }
 0x2bb   : > { %v1919_v31 = vadd.f32 %v1918_v19, %v1870_v28 }
 0x2bc   : > { %v1825_v14 = vpop.f32.mrf.mxu2  ;;  %v1970_v38 = vpop.f32.mrf.mxu1 }
 0x2bd   : > { %v3922_v16 = vadd.f32 %v1967_v22, %v1919_v31  ;;  %v1874_v46 = vpop.f32.mrf.mxu3  ;;  %v1826_v35 = vadd.f32 %v3883_v11, %v1825_v14 }
 0x2bf   : > { %v1997_v37 = vmul.f32 %v3922_v16, %v3922_v16  ;;  %v1875_v8 = vadd.f32 %v1874_v46, %v1826_v35 }
 0x2c1   : > { %2020 = vadd.xlane.f32.xlu1 %v1997_v37 }
 0x2c2   : > { %v1921_v39 = vpop.f32.mrf.mxu0 }
 0x2c3   : > { %v1922_v58 = vadd.f32 %v1921_v39, %v1873_v17 }
 0x2c4   : > { %v1828_v40 = vpop.f32.mrf.mxu2  ;;  %v1972_v23 = vpop.f32.mrf.mxu1 }
 0x2c5   : > { %v3927_v61 = vadd.f32 %v1970_v38, %v1922_v58  ;;  %v1877_v26 = vpop.f32.mrf.mxu3  ;;  %v1829_v52 = vadd.f32 %v3883_v11, %v1828_v40 }
 0x2c7   : > { %v1998_v49 = vmul.f32 %v3927_v61, %v3927_v61  ;;  %v1878_v43 = vadd.f32 %v1877_v26, %v1829_v52 }
 0x2c9   : > { %2022 = vadd.xlane.f32.xlu2 %v1998_v49 }
 0x2ca   : > { %v1923_v27 = vpop.f32.mrf.mxu0 }
 0x2cb   : > { %v1924_v29 = vadd.f32 %v1923_v27, %v1875_v8 }
 0x2cc   : > { %v1830_v60 = vpop.f32.mrf.mxu2  ;;  %v1975_v33 = vpop.f32.mrf.mxu1 }
 0x2cd   : > { %v3932_v21 = vadd.f32 %v1972_v23, %v1924_v29  ;;  %v1879_v42 = vpop.f32.mrf.mxu3  ;;  %v1831_v45 = vadd.f32 %v3883_v11, %v1830_v60 }
 0x2cf   : > { %v1999_v54 = vmul.f32 %v3932_v21, %v3932_v21  ;;  %v1880_v3 = vadd.f32 %v1879_v42, %v1831_v45 }
 0x2d1   : > { %2024 = vadd.xlane.f32.xlu0 %v1999_v54 }
 0x2d2   : > { %v1926_v59 = vpop.f32.mrf.mxu0 }
 0x2d3   : > { %v1927_v7 = vadd.f32 %v1926_v59, %v1878_v43 }
 0x2d4   : > { %v1833_v57 = vpop.f32.mrf.mxu2  ;;  %v1977_v63 = vpop.f32.mrf.mxu1 }
 0x2d5   : > { %v3937_v0 = vadd.f32 %v1975_v33, %v1927_v7  ;;  %v1882_v10 = vpop.f32.mrf.mxu3  ;;  %v1834_v13 = vadd.f32 %v3883_v11, %v1833_v57 }
 0x2d7   : > { %v2000_v6 = vmul.f32 %v3937_v0, %v3937_v0  ;;  %v1883_v55 = vadd.f32 %v1882_v10, %v1834_v13 }
 0x2d9   : > { %2026 = vadd.xlane.f32.xlu1 %v2000_v6 }
 0x2da   : > { %v1928_v47 = vpop.f32.mrf.mxu0 }
 0x2db   : > { %v1929_v4 = vadd.f32 %v1928_v47, %v1880_v3 }
 0x2dc   : > { %v1835_v51 = vpop.f32.mrf.mxu2  ;;  %v1980_v53 = vpop.f32.mrf.mxu1 }
 0x2dd   : > { %v3942_v50 = vadd.f32 %v1977_v63, %v1929_v4  ;;  %v1884_v1 = vpop.f32.mrf.mxu3  ;;  %v1836_v24 = vadd.f32 %v3883_v11, %v1835_v51 }
 0x2df   : > { %v2001_v56 = vmul.f32 %v3942_v50, %v3942_v50  ;;  %v1885_v18 = vadd.f32 %v1884_v1, %v1836_v24 }
 0x2e1   : > { %2028 = vadd.xlane.f32.xlu2 %v2001_v56 }
 0x2e2   : > { %v1931_v15 = vpop.f32.mrf.mxu0 }
 0x2e3   : > { %v1932_v41 = vadd.f32 %v1931_v15, %v1883_v55 }
 0x2e4   : > { %v1838_v5 = vpop.f32.mrf.mxu2  ;;  %v1982_v22 = vpop.f32.mrf.mxu1 }
 0x2e5   : > { %v3947_v25 = vadd.f32 %v1980_v53, %v1932_v41  ;;  %v1839_v28 = vadd.f32 %v3883_v11, %v1838_v5  ;;  %v1887_v31 = vpop.f32.mrf.mxu3 }
 0x2e7   : > { %v2002_v34 = vmul.f32 %v3947_v25, %v3947_v25  ;;  %v1888_v38 = vadd.f32 %v1887_v31, %v1839_v28 }
 0x2e9   : > { %2030 = vadd.xlane.f32.xlu0 %v2002_v34 }
 0x2ea   : > { %v1933_v9 = vpop.f32.mrf.mxu0 }
 0x2eb   : > { %v1934_v30 = vadd.f32 %v1933_v9, %v1885_v18 }
 0x2ec   : > { %v1840_v32 = vpop.f32.mrf.mxu2  ;;  %v1985_v46 = vpop.f32.mrf.mxu1 }
 0x2ed   : > { %v3952_v19 = vadd.f32 %v1982_v22, %v1934_v30  ;;  %v1841_v39 = vadd.f32 %v3883_v11, %v1840_v32  ;;  %v1889_v23 = vpop.f32.mrf.mxu3 }
 0x2ef   : > { %v2003_v14 = vmul.f32 %v3952_v19, %v3952_v19  ;;  %v1890_v35 = vadd.f32 %v1889_v23, %v1841_v39 }
 0x2f1   : > { %2032 = vadd.xlane.f32.xlu1 %v2003_v14 }
 0x2f2   : > { %v1936_v37 = vpop.f32.mrf.mxu0 }
 0x2f3   : > { %v1937_v17 = vadd.f32 %v1936_v37, %v1888_v38 }
 0x2f4   : > { %v1987_v8 = vpop.f32.mrf.mxu1 }
 0x2f5   : > { %v3957_v58 = vadd.f32 %v1985_v46, %v1937_v17 }
 0x2f7   : > { %v2004_v40 = vmul.f32 %v3957_v58, %v3957_v58 }
 0x2f9   : > { %2034 = vadd.xlane.f32.xlu2 %v2004_v40 }
 0x2fa   : > { %v1938_v26 = vpop.f32.mrf.mxu0 }
 0x2fb   : > { %v1939_v49 = vadd.f32 %v1938_v26, %v1890_v35 }
 0x2fc   : > { %v2007_v27 = vpop.xlane.xlu0 %2006 }
 0x2fd   : > { %v3961_v29 = vadd.f32 %v1987_v8, %v1939_v49  ;;  %v2038_v60 = vmax.f32 %v2007_v27, 1e-24 }
 0x2ff   : > { %3091 = vrsqrt.f32 %v2038_v60  ;;  %v2005_v33 = vmul.f32 %v3961_v29, %v3961_v29  ;;  %vm2060_vm1 = vweird.f32 %v2038_v60 }
 0x301   : > { %2036 = vadd.xlane.f32.xlu0 %v2005_v33 }
 0x304   : > { %v2009_v11 = vpop.xlane.xlu0 %2008 }
 0x305   : > { %v3092_v52 = vpop.eup %3091  ;;  %v2039_v54 = vmax.f32 %v2009_v11, 1e-24 }
 0x306   : > { %v2055_v42 = vmul.f32 %v3092_v52, %v2038_v60  ;;  %vm2061_vm0 = vweird.f32 %v3092_v52 }
 0x307   : > { %3093 = vrsqrt.f32 %v2039_v54  ;;  %vm2062_vm2 = vmor %vm2060_vm1, %vm2061_vm0  ;;  %vm2070_vm4 = vweird.f32 %v2039_v54 }
 0x308   : > { %v2056_v43 = vmul.f32 %v3092_v52, %v2055_v42 }
 0x30a   : > { %v2057_v59 = vmul.f32 0.5, %v2056_v43 }
 0x30c   : > { %v2058_v7 = vsub.f32 1.5, %v2057_v59  ;;  %v2011_v57 = vpop.xlane.xlu1 %2010 }
 0x30d   : > { %v3094_v63 = vpop.eup %3093  ;;  %v2040_v45 = vmax.f32 %v2011_v57, 1e-24 }
 0x30e   : > { %v2059_v6 = vmul.f32 %v3092_v52, %v2058_v7  ;;  %v2065_v3 = vmul.f32 %v3094_v63, %v2039_v54  ;;  %vm2071_vm3 = vweird.f32 %v3094_v63 }
 0x30f   : > { %3095 = vrsqrt.f32 %v2040_v45  ;;  %vm2072_vm5 = vmor %vm2070_vm4, %vm2071_vm3  ;;  %vm2080_vm7 = vweird.f32 %v2040_v45 }
 0x310   : > { %v2063_v10 = vsel %vm2062_vm2, %v3092_v52, %v2059_v6  ;;  %v2066_v47 = vmul.f32 %v3094_v63, %v2065_v3 }
 0x311   : > { %v2214_v4 = vmul.f32 %v2063_v10, %v3887_v36 }
 0x312   : > { %v2067_v13 = vmul.f32 0.5, %v2066_v47 }
 0x313   : > { %2230 = vst [vmem:[%s3968_s15] sm:$0xff] %v2214_v4 }
 0x314   : > { %v2068_v51 = vsub.f32 1.5, %v2067_v13  ;;  %v2013_v53 = vpop.xlane.xlu1 %2012 }
 0x315   : > { %v3096_v56 = vpop.eup %3095  ;;  %v2041_v55 = vmax.f32 %v2013_v53, 1e-24 }
 0x316   : > { %v2069_v15 = vmul.f32 %v3094_v63, %v2068_v51  ;;  %v2075_v41 = vmul.f32 %v3096_v56, %v2040_v45  ;;  %vm2081_vm6 = vweird.f32 %v3096_v56 }
 0x317   : > { %3097 = vrsqrt.f32 %v2041_v55  ;;  %vm2082_vm8 = vmor %vm2080_vm7, %vm2081_vm6  ;;  %vm2090_vm10 = vweird.f32 %v2041_v55 }
 0x318   : > { %v2073_v1 = vsel %vm2072_vm5, %v3094_v63, %v2069_v15  ;;  %v2076_v24 = vmul.f32 %v3096_v56, %v2075_v41 }
 0x319   : > { %v2215_v36 = vmul.f32 %v2073_v1, %v3892_v20 }
 0x31a   : > { %v2077_v5 = vmul.f32 0.5, %v2076_v24 }
 0x31b   : > { %2231 = vst [vmem:[%s3968_s15 + $0x8] sm:$0xff] %v2215_v36 }
 0x31c   : > { %v2078_v34 = vsub.f32 1.5, %v2077_v5  ;;  %v2015_v22 = vpop.xlane.xlu2 %2014 }
 0x31d   : > { %v3098_v18 = vpop.eup %3097  ;;  %v2042_v9 = vmax.f32 %v2015_v22, 1e-24 }
 0x31e   : > { %v2079_v30 = vmul.f32 %v3096_v56, %v2078_v34  ;;  %v2085_v28 = vmul.f32 %v3098_v18, %v2041_v55  ;;  %vm2091_vm9 = vweird.f32 %v3098_v18 }
 0x31f   : > { %3099 = vrsqrt.f32 %v2042_v9  ;;  %vm2092_vm11 = vmor %vm2090_vm10, %vm2091_vm9  ;;  %vm2100_vm13 = vweird.f32 %v2042_v9 }
 0x320   : > { %v2083_v31 = vsel %vm2082_vm8, %v3096_v56, %v2079_v30  ;;  %v2086_v14 = vmul.f32 %v3098_v18, %v2085_v28 }
 0x321   : > { %v2216_v38 = vmul.f32 %v2083_v31, %v3897_v2 }
 0x322   : > { %v2087_v32 = vmul.f32 0.5, %v2086_v14 }
 0x323   : > { %2232 = vst [vmem:[%s3968_s15 + $0x10] sm:$0xff] %v2216_v38 }
 0x324   : > { %v2088_v20 = vsub.f32 1.5, %v2087_v32  ;;  %v2017_v46 = vpop.xlane.xlu2 %2016 }
 0x325   : > { %v3100_v37 = vpop.eup %3099  ;;  %v2043_v17 = vmax.f32 %v2017_v46, 1e-24 }
 0x326   : > { %v2089_v39 = vmul.f32 %v3098_v18, %v2088_v20  ;;  %v2095_v40 = vmul.f32 %v3100_v37, %v2042_v9  ;;  %vm2101_vm12 = vweird.f32 %v3100_v37 }
 0x327   : > { %3101 = vrsqrt.f32 %v2043_v17  ;;  %vm2102_vm14 = vmor %vm2100_vm13, %vm2101_vm12  ;;  %vm2110_vm0 = vweird.f32 %v2043_v17 }
 0x328   : > { %v2093_v23 = vsel %vm2092_vm11, %v3098_v18, %v2089_v39  ;;  %v2096_v35 = vmul.f32 %v3100_v37, %v2095_v40 }
 0x329   : > { %v2217_v26 = vmul.f32 %v2093_v23, %v3902_v12 }
 0x32a   : > { %v2097_v49 = vmul.f32 0.5, %v2096_v35 }
 0x32b   : > { %2233 = vst [vmem:[%s3968_s15 + $0x18] sm:$0xff] %v2217_v26 }
 0x32c   : > { %v2098_v2 = vsub.f32 1.5, %v2097_v49  ;;  %v2019_v8 = vpop.xlane.xlu0 %2018 }
 0x32d   : > { %v3102_v27 = vpop.eup %3101  ;;  %v2044_v60 = vmax.f32 %v2019_v8, 1e-24 }
 0x32e   : > { %v2099_v33 = vmul.f32 %v3100_v37, %v2098_v2  ;;  %v2105_v11 = vmul.f32 %v3102_v27, %v2043_v17  ;;  %vm2111_vm15 = vweird.f32 %v3102_v27 }
 0x32f   : > { %3103 = vrsqrt.f32 %v2044_v60  ;;  %vm2112_vm1 = vmor %vm2110_vm0, %vm2111_vm15  ;;  %vm2120_vm3 = vweird.f32 %v2044_v60 }
 0x330   : > { %v2103_v52 = vsel %vm2102_vm14, %v3100_v37, %v2099_v33  ;;  %v2106_v54 = vmul.f32 %v3102_v27, %v2105_v11 }
 0x331   : > { %v2218_v42 = vmul.f32 %v2103_v52, %v3907_v48 }
 0x332   : > { %v2107_v43 = vmul.f32 0.5, %v2106_v54 }
 0x333   : > { %2234 = vst [vmem:[%s3968_s15 + $0x20] sm:$0xff] %v2218_v42 }
 0x334   : > { %v2108_v12 = vsub.f32 1.5, %v2107_v43  ;;  %v2021_v59 = vpop.xlane.xlu1 %2020 }
 0x335   : > { %v3104_v7 = vpop.eup %3103  ;;  %v2045_v57 = vmax.f32 %v2021_v59, 1e-24 }
 0x336   : > { %v2109_v63 = vmul.f32 %v3102_v27, %v2108_v12  ;;  %v2115_v45 = vmul.f32 %v3104_v7, %v2044_v60  ;;  %vm2121_vm2 = vweird.f32 %v3104_v7 }
 0x337   : > { %3105 = vrsqrt.f32 %v2045_v57  ;;  %vm2122_vm4 = vmor %vm2120_vm3, %vm2121_vm2  ;;  %vm2130_vm6 = vweird.f32 %v2045_v57 }
 0x338   : > { %v2113_v6 = vsel %vm2112_vm1, %v3102_v27, %v2109_v63  ;;  %v2116_v3 = vmul.f32 %v3104_v7, %v2115_v45 }
 0x339   : > { %v2219_v10 = vmul.f32 %v2113_v6, %v3912_v62 }
 0x33a   : > { %v2117_v47 = vmul.f32 0.5, %v2116_v3 }
 0x33b   : > { %2235 = vst [vmem:[%s3968_s15 + $0x28] sm:$0xff] %v2219_v10 }
 0x33c   : > { %v2118_v48 = vsub.f32 1.5, %v2117_v47  ;;  %v2023_v4 = vpop.xlane.xlu2 %2022 }
 0x33d   : > { %v3106_v13 = vpop.eup %3105  ;;  %v2046_v51 = vmax.f32 %v2023_v4, 1e-24 }
 0x33e   : > { %v2119_v53 = vmul.f32 %v3104_v7, %v2118_v48  ;;  %v2125_v56 = vmul.f32 %v3106_v13, %v2045_v57  ;;  %vm2131_vm5 = vweird.f32 %v3106_v13 }
 0x33f   : > { %3107 = vrsqrt.f32 %v2046_v51  ;;  %vm2132_vm7 = vmor %vm2130_vm6, %vm2131_vm5  ;;  %vm2140_vm9 = vweird.f32 %v2046_v51 }
 0x340   : > { %v2123_v55 = vsel %vm2122_vm4, %v3104_v7, %v2119_v53  ;;  %v2126_v15 = vmul.f32 %v3106_v13, %v2125_v56 }
 0x341   : > { %v2220_v41 = vmul.f32 %v2123_v55, %v3917_v44 }
 0x342   : > { %v2127_v1 = vmul.f32 0.5, %v2126_v15 }
 0x343   : > { %2236 = vst [vmem:[%s3968_s15 + $0x30] sm:$0xff] %v2220_v41 }
 0x344   : > { %v2128_v62 = vsub.f32 1.5, %v2127_v1  ;;  %v2025_v24 = vpop.xlane.xlu0 %2024 }
 0x345   : > { %v3108_v36 = vpop.eup %3107  ;;  %v2047_v5 = vmax.f32 %v2025_v24, 1e-24 }
 0x346   : > { %v2129_v34 = vmul.f32 %v3106_v13, %v2128_v62  ;;  %v2135_v22 = vmul.f32 %v3108_v36, %v2046_v51  ;;  %vm2141_vm8 = vweird.f32 %v3108_v36 }
 0x347   : > { %3109 = vrsqrt.f32 %v2047_v5  ;;  %vm2142_vm10 = vmor %vm2140_vm9, %vm2141_vm8  ;;  %vm2150_vm12 = vweird.f32 %v2047_v5 }
 0x348   : > { %v2133_v18 = vsel %vm2132_vm7, %v3106_v13, %v2129_v34  ;;  %v2136_v9 = vmul.f32 %v3108_v36, %v2135_v22 }
 0x349   : > { %v2221_v30 = vmul.f32 %v2133_v18, %v3922_v16 }
 0x34a   : > { %v2137_v28 = vmul.f32 0.5, %v2136_v9 }
 0x34b   : > { %2237 = vst [vmem:[%s3968_s15 + $0x38] sm:$0xff] %v2221_v30 }
 0x34c   : > { %v2138_v44 = vsub.f32 1.5, %v2137_v28  ;;  %v2027_v31 = vpop.xlane.xlu1 %2026 }
 0x34d   : > { %v3110_v14 = vpop.eup %3109  ;;  %v2048_v38 = vmax.f32 %v2027_v31, 1e-24 }
 0x34e   : > { %v2139_v32 = vmul.f32 %v3108_v36, %v2138_v44  ;;  %v2145_v20 = vmul.f32 %v3110_v14, %v2047_v5  ;;  %vm2151_vm11 = vweird.f32 %v3110_v14 }
 0x34f   : > { %3111 = vrsqrt.f32 %v2048_v38  ;;  %vm2152_vm13 = vmor %vm2150_vm12, %vm2151_vm11  ;;  %vm2160_vm15 = vweird.f32 %v2048_v38 }
 0x350   : > { %v2143_v46 = vsel %vm2142_vm10, %v3108_v36, %v2139_v32  ;;  %v2146_v37 = vmul.f32 %v3110_v14, %v2145_v20 }
 0x351   : > { %v2222_v17 = vmul.f32 %v2143_v46, %v3927_v61 }
 0x352   : > { %v2147_v39 = vmul.f32 0.5, %v2146_v37 }
 0x353   : > { %2238 = vst [vmem:[%s3968_s15 + $0x40] sm:$0xff] %v2222_v17 }
 0x354   : > { %v2148_v16 = vsub.f32 1.5, %v2147_v39  ;;  %v2029_v40 = vpop.xlane.xlu2 %2028 }
 0x355   : > { %v3112_v23 = vpop.eup %3111  ;;  %v2049_v35 = vmax.f32 %v2029_v40, 1e-24 }
 0x356   : > { %v2149_v26 = vmul.f32 %v3110_v14, %v2148_v16  ;;  %v2155_v49 = vmul.f32 %v3112_v23, %v2048_v38  ;;  %vm2161_vm14 = vweird.f32 %v3112_v23 }
 0x357   : > { %3113 = vrsqrt.f32 %v2049_v35  ;;  %vm2162_vm0 = vmor %vm2160_vm15, %vm2161_vm14  ;;  %vm2170_vm2 = vweird.f32 %v2049_v35 }
 0x358   : > { %v2153_v2 = vsel %vm2152_vm13, %v3110_v14, %v2149_v26  ;;  %v2156_v8 = vmul.f32 %v3112_v23, %v2155_v49 }
 0x359   : > { %v2223_v27 = vmul.f32 %v2153_v2, %v3932_v21 }
 0x35a   : > { %v2157_v60 = vmul.f32 0.5, %v2156_v8 }
 0x35b   : > { %2239 = vst [vmem:[%s3968_s15 + $0x48] sm:$0xff] %v2223_v27 }
 0x35c   : > { %v2158_v61 = vsub.f32 1.5, %v2157_v60  ;;  %v2031_v33 = vpop.xlane.xlu0 %2030 }
 0x35d   : > { %v3114_v11 = vpop.eup %3113  ;;  %v2050_v52 = vmax.f32 %v2031_v33, 1e-24 }
 0x35e   : > { %v2159_v54 = vmul.f32 %v3112_v23, %v2158_v61  ;;  %v2165_v42 = vmul.f32 %v3114_v11, %v2049_v35  ;;  %vm2171_vm1 = vweird.f32 %v3114_v11 }
 0x35f   : > { %3115 = vrsqrt.f32 %v2050_v52  ;;  %vm2172_vm3 = vmor %vm2170_vm2, %vm2171_vm1  ;;  %vm2180_vm5 = vweird.f32 %v2050_v52 }
 0x360   : > { %v2163_v43 = vsel %vm2162_vm0, %v3112_v23, %v2159_v54  ;;  %v2166_v12 = vmul.f32 %v3114_v11, %v2165_v42 }
 0x361   : > { %v2224_v59 = vmul.f32 %v2163_v43, %v3937_v0 }
 0x362   : > { %v2167_v7 = vmul.f32 0.5, %v2166_v12 }
 0x363   : > { %2240 = vst [vmem:[%s3968_s15 + $0x50] sm:$0xff] %v2224_v59 }
 0x364   : > { %v2168_v21 = vsub.f32 1.5, %v2167_v7  ;;  %v2033_v57 = vpop.xlane.xlu1 %2032 }
 0x365   : > { %v3116_v63 = vpop.eup %3115  ;;  %v2051_v45 = vmax.f32 %v2033_v57, 1e-24 }
 0x366   : > { %v2169_v6 = vmul.f32 %v3114_v11, %v2168_v21  ;;  %v2175_v3 = vmul.f32 %v3116_v63, %v2050_v52  ;;  %vm2181_vm4 = vweird.f32 %v3116_v63 }
 0x367   : > { %3117 = vrsqrt.f32 %v2051_v45  ;;  %vm2182_vm6 = vmor %vm2180_vm5, %vm2181_vm4  ;;  %vm2190_vm8 = vweird.f32 %v2051_v45 }
 0x368   : > { %v2173_v10 = vsel %vm2172_vm3, %v3114_v11, %v2169_v6  ;;  %v2176_v47 = vmul.f32 %v3116_v63, %v2175_v3 }
 0x369   : > { %v2225_v48 = vmul.f32 %v2173_v10, %v3942_v50 }
 0x36a   : > { %v2177_v4 = vmul.f32 0.5, %v2176_v47 }
 0x36b   : > { %2241 = vst [vmem:[%s3968_s15 + $0x58] sm:$0xff] %v2225_v48 }
 0x36c   : > { %v2178_v0 = vsub.f32 1.5, %v2177_v4  ;;  %v2035_v13 = vpop.xlane.xlu2 %2034 }
 0x36d   : > { %v3118_v51 = vpop.eup %3117  ;;  %v2052_v53 = vmax.f32 %v2035_v13, 1e-24 }
 0x36e   : > { %v2179_v56 = vmul.f32 %v3116_v63, %v2178_v0  ;;  %v2185_v55 = vmul.f32 %v3118_v51, %v2051_v45  ;;  %vm2191_vm7 = vweird.f32 %v3118_v51 }
 0x36f   : > { %3119 = vrsqrt.f32 %v2052_v53  ;;  %vm2192_vm9 = vmor %vm2190_vm8, %vm2191_vm7  ;;  %vm2200_vm11 = vweird.f32 %v2052_v53 }
 0x370   : > { %v2183_v15 = vsel %vm2182_vm6, %v3116_v63, %v2179_v56  ;;  %v2186_v41 = vmul.f32 %v3118_v51, %v2185_v55 }
 0x371   : > { %v2226_v1 = vmul.f32 %v2183_v15, %v3947_v25 }
 0x372   : > { %v2187_v62 = vmul.f32 0.5, %v2186_v41 }
 0x373   : > { %2242 = vst [vmem:[%s3968_s15 + $0x60] sm:$0xff] %v2226_v1 }
 0x374   : > { %v2188_v50 = vsub.f32 1.5, %v2187_v62  ;;  %v2037_v24 = vpop.xlane.xlu0 %2036 }
 0x375   : > { %v3120_v36 = vpop.eup %3119  ;;  %v2053_v5 = vmax.f32 %v2037_v24, 1e-24 }
 0x376   : > { %v2189_v34 = vmul.f32 %v3118_v51, %v2188_v50  ;;  %v2195_v22 = vmul.f32 %v3120_v36, %v2052_v53  ;;  %vm2201_vm10 = vweird.f32 %v3120_v36 }
 0x377   : > { %3121 = vrsqrt.f32 %v2053_v5  ;;  %vm2202_vm12 = vmor %vm2200_vm11, %vm2201_vm10  ;;  %vm2210_vm14 = vweird.f32 %v2053_v5 }
 0x378   : > { %v2193_v18 = vsel %vm2192_vm9, %v3118_v51, %v2189_v34  ;;  %v2196_v9 = vmul.f32 %v3120_v36, %v2195_v22 }
 0x379   : > { %v2227_v30 = vmul.f32 %v2193_v18, %v3952_v19 }
 0x37a   : > { %v2197_v25 = vmul.f32 0.5, %v2196_v9 }
 0x37b   : > { %2243 = vst [vmem:[%s3968_s15 + $0x68] sm:$0xff] %v2227_v30 }
 0x37c   : > { %v2198_v28 = vsub.f32 1.5, %v2197_v25 }
 0x37d   : > { %v3122_v44 = vpop.eup %3121 }
 0x37e   : > { %v2199_v31 = vmul.f32 %v3120_v36, %v2198_v28  ;;  %v2205_v14 = vmul.f32 %v3122_v44, %v2053_v5  ;;  %vm2211_vm13 = vweird.f32 %v3122_v44 }
 0x37f   : > { %vm2212_vm15 = vmor %vm2210_vm14, %vm2211_vm13 }
 0x380   : > { %v2203_v38 = vsel %vm2202_vm12, %v3120_v36, %v2199_v31  ;;  %v2206_v32 = vmul.f32 %v3122_v44, %v2205_v14 }
 0x381   : > { %v2228_v20 = vmul.f32 %v2203_v38, %v3957_v58 }
 0x382   : > { %v2207_v46 = vmul.f32 0.5, %v2206_v32 }
 0x383   : > { %2244 = vst [vmem:[%s3968_s15 + $0x70] sm:$0xff] %v2228_v20 }
 0x384   : > { %v2208_v19 = vsub.f32 1.5, %v2207_v46 }
 0x386   : > { %v2209_v37 = vmul.f32 %v3122_v44, %v2208_v19 }
 0x388   : > { %v2213_v17 = vsel %vm2212_vm15, %v3122_v44, %v2209_v37 }
 0x389   : > { %v2229_v58 = vmul.f32 %v2213_v17, %v3961_v29 }
 0x38b   : > { %2245 = vst [vmem:[%s3968_s15 + $0x78] sm:$0xff] %v2229_v58 }
 0x38c   : > { %3330 = shalt.err (!%p3327_p8)
}
 0x38d   : > { %s3394_s20 = smov 128   ;;  %s3395_s15 = smov 8  }
 0x38e   : > { %3007 = dma.vmem_to_hbm [thread:$0]  (%p3524_p12), %s2260_s22, 2048, %s2262_s23, %s2247_s8, %s3394_s20, %s3394_s20, %s3395_s15  }
 0x38f PF: > { %p3044_p9 = scmp.ge.s32.totalorder %s3381_s27, 2  ;;  %s2276_s28 = sand.u32 1, %s3369_s24  }
 0x390   : > { %s2277_s13 = scalar_lea.sflag [#allocation4], %s2276_s28 }
 0x391   : > { %p3030_p10 = pnand %p3044_p9, %p3529_p2 }
 0x393   : > { %p3031_p13 = pneg %p3030_p10 }
 0x395   : > { %3364 = dma.done.wait (%p3031_p13), %s2277_s13, 2048  }
 0x396   : > { %3366 = vsyncadd (%p3031_p13), %s2277_s13, 4294965248  ;;  %p23_p0 = scmp.ge.s32.totalorder %s3504_s10, 6   ;;  %s4054_s24 = smov %s3373_s25 }
 0x397   : > { %s4055_s25 = smov %s3377_s26  ;;  %s4056_s26 = smov %s3516_s30 }
 0x398   : > { %s4057_s27 = smov %s3504_s10  ;;  %25 = sbr.rel (!%p23_p0) target bundleno = 10 (0xa), region = 113 }
 0x39d   :  { %2283 = vsyncpa [#allocation3], 1 }
 0x39e   :  { %2285 = vsyncpa [#allocation3 + $0x1], 1 }
 0x39f   :  { %2286 = vsyncpa [#allocation6], 1 }
 0x3a0   :  { %2287 = vsyncpa [#allocation9], 1 }
 0x3a1   :  { %2288 = vsyncpa [#allocation12], 1 }
 0x3a2   :  { %2289 = vsyncpa [#allocation4], 1 }
 0x3a3   :  { %2291 = vsyncpa [#allocation4 + $0x1], 1 }

</bundles_post_ra>
